<compile_context>
chip_gen: v7x
topology: tpu7x:2x2x1
jax: 0.10.0
libtpu: 0.0.40
codegen_flags: <defaults>
</compile_context>

<pallas_src>
import functools

import numpy as np
import jax
import jax.numpy as jnp
from jax import lax
from jax.experimental import pallas as pl
from jax.experimental.pallas import tpu as pltpu

EPS = 1e-3  # ChannelNorm2d eps


def _filtering_block_kernel(x_ref, masks_ref, w1e_ref, w2f_ref, pvec_ref, o_ref,
                            *, H, W, Cin, Cout):
    HW = H * W
    x = x_ref[0].astype(jnp.float32)                         # (Cin, HW), lanes = HW

    def im2col(inp):
        # Stack the 9 rolled + border-masked taps into one (9*C, HW) slab so each conv
        # is a single MXU matmul (accumulation happens inside the MXU pass instead of
        # 9 tiny K=C matmuls + 8 full-width VALU adds).
        rows = []
        for t in range(9):
            dy, dx = t // 3, t % 3
            shift = (dy - 1) * W + (dx - 1)
            if shift == 0:
                rows.append(inp)                              # centre tap: no shift/mask
            else:
                # TODO(synk): pltpu.roll(inp, (-shift) % HW, axis=1) on HW builds (XLU vrot).
                shifted = jnp.roll(inp, -shift, axis=1)
                rows.append(shifted * masks_ref[t:t + 1, :])  # (1, HW) border mask
        return jnp.concatenate(rows, axis=0)                  # (9*C, HW)

    def channel_norm(v, g, be):
        c = v.shape[0]
        mean = jnp.mean(v, axis=0, keepdims=True)             # small sublane reduce
        var = jnp.sum((v - mean) ** 2, axis=0, keepdims=True) / (c - 1)
        return (v - mean) / (jnp.sqrt(var) + EPS) * g + be    # exact divide (parity)

    # conv1 + 1x1 residual projection fused into ONE matmul:
    #   rows 0:Cout of w1e = conv1 3x3 taps, rows Cout:2*Cout = wp on centre-tap columns.
    #   bias column 0 of pvec = [b1; bp].
    patches1 = im2col(x)                                      # (9*Cin, HW)
    z = jnp.dot(w1e_ref[...], patches1,
                preferred_element_type=jnp.float32,
                precision=lax.Precision.HIGHEST) + pvec_ref[:, 0:1]
    y = z[0:Cout]                                             # conv1 pre-norm
    resid = z[Cout:2 * Cout]                                  # proj(x) + bp

    # ChannelNorm -> ReLU
    y = jnp.maximum(channel_norm(y, pvec_ref[0:Cout, 1:2], pvec_ref[0:Cout, 2:3]), 0.0)

    # conv2 (single fused matmul, K = 9*Cout) -> ChannelNorm
    patches2 = im2col(y)                                      # (9*Cout, HW)
    y = jnp.dot(w2f_ref[...], patches2,
                preferred_element_type=jnp.float32,
                precision=lax.Precision.HIGHEST) + pvec_ref[0:Cout, 3:4]
    y = channel_norm(y, pvec_ref[Cout:2 * Cout, 1:2], pvec_ref[Cout:2 * Cout, 2:3])

    o_ref[0] = jnp.maximum(y + resid, 0.0).astype(o_ref.dtype)   # lane-dense store


def _tap_masks(H, W):
    """(9, H*W) float masks: 1 where the shifted tap stays inside the image."""
    f = np.arange(H * W)
    row, col = f // W, f % W
    m = []
    for dy in range(3):
        for dx in range(3):
            sy, sx = dy - 1, dx - 1
            m.append(((row + sy >= 0) & (row + sy < H) &
                      (col + sx >= 0) & (col + sx < W)).astype(np.float32))
    return jnp.asarray(np.stack(m))                            # (9, HW)


def filtering_block(x_nchw, params):
    """x_nchw: (B, Cin, H, W) float32. Params use PyTorch layouts (OIHW conv weights)."""
    B, Cin, H, W = x_nchw.shape
    Cout = params["w1"].shape[0]
    HW = H * W

    xf = x_nchw.reshape(B, Cin, HW)
    masks = _tap_masks(H, W)                                   # (9, HW), taps on sublanes

    # Fused conv weights: (Cout, 9*C) so each conv is a single matmul over K = 9*C.
    w1f = jnp.transpose(params["w1"], (0, 2, 3, 1)).reshape(Cout, 9 * Cin)
    w2f = jnp.transpose(params["w2"], (0, 2, 3, 1)).reshape(Cout, 9 * Cout)
    wp = params["wp"].reshape(Cout, Cin)
    # Fold the 1x1 residual projection into conv1's fused weight: extra Cout output rows
    # that only read the un-shifted centre-tap (t=4) columns of the im2col slab.
    w1e = jnp.zeros((2 * Cout, 9 * Cin), jnp.float32)
    w1e = w1e.at[:Cout, :].set(w1f)
    w1e = w1e.at[Cout:, 4 * Cin:5 * Cin].set(wp)

    # All seven per-channel vectors in ONE (2*Cout, 4) array / BlockSpec:
    #   col0 = [b1; bp], col1 = [g1; g2], col2 = [be1; be2], col3 = [b2; 0].
    zc = jnp.zeros((Cout,), jnp.float32)
    pvec = jnp.stack([
        jnp.concatenate([params["b1"], params["bp"]]),
        jnp.concatenate([params["g1"], params["g2"]]),
        jnp.concatenate([params["be1"], params["be2"]]),
        jnp.concatenate([params["b2"], zc]),
    ], axis=1)                                                 # (2*Cout, 4)

    kernel = functools.partial(_filtering_block_kernel, H=H, W=W, Cin=Cin, Cout=Cout)

    def bcast(shape):
        n = len(shape)
        return pl.BlockSpec(shape, lambda b, _n=n: (0,) * _n)

    out_flat = pl.pallas_call(
        kernel,
        out_shape=jax.ShapeDtypeStruct((B, Cout, HW), jnp.float32),
        grid_spec=pltpu.PrefetchScalarGridSpec(
            num_scalar_prefetch=0,
            grid=(B,),
            # TODO(synk): production sizes -> grid=(B, n_row_tiles) with a 1-row halo,
            # tile sized against v7x's 64 MiB VMEM.
            in_specs=[
                pl.BlockSpec((1, Cin, HW), lambda b: (b, 0, 0)),
                bcast((9, HW)),
                bcast((2 * Cout, 9 * Cin)),
                bcast((Cout, 9 * Cout)),
                bcast((2 * Cout, 4)),
            ],
            out_specs=pl.BlockSpec((1, Cout, HW), lambda b: (b, 0, 0)),
        ),
        # Batch images are independent.  TODO(synk): on v7x confirm both TensorCores are
        # busy in the profile; switch to pltpu.CORE_PARALLEL (or pl.core_map) if one idles.
        compiler_params=pltpu.CompilerParams(
            dimension_semantics=("parallel",),
            vmem_limit_bytes=32 * 1024 * 1024,
        ),
    )(xf, masks, w1e, w2f, pvec)

    return out_flat.reshape(B, Cout, H, W)


# ---------------- pure-JAX reference (for correctness check) ----------------
def _channel_norm_ref(x, gamma, beta):
    mean = jnp.mean(x, axis=1, keepdims=True)
    var = jnp.sum((x - mean) ** 2, axis=1, keepdims=True) / (x.shape[1] - 1)
    xn = (x - mean) / (jnp.sqrt(var) + EPS)
    return xn * gamma.reshape(1, -1, 1, 1) + beta.reshape(1, -1, 1, 1)


def _ref_forward(x, p):
    dn = ("NCHW", "OIHW", "NCHW")
    hp = lax.Precision.HIGHEST
    y = lax.conv_general_dilated(x, p["w1"], (1, 1), "SAME", dimension_numbers=dn,
                                 precision=hp) + p["b1"].reshape(1, -1, 1, 1)
    y = jax.nn.relu(_channel_norm_ref(y, p["g1"], p["be1"]))
    y = lax.conv_general_dilated(y, p["w2"], (1, 1), "SAME", dimension_numbers=dn,
                                 precision=hp) + p["b2"].reshape(1, -1, 1, 1)
    y = _channel_norm_ref(y, p["g2"], p["be2"])
    r = lax.conv_general_dilated(x, p["wp"], (1, 1), "SAME", dimension_numbers=dn,
                                 precision=hp) + p["bp"].reshape(1, -1, 1, 1)
    return jax.nn.relu(y + r)


if __name__ == "__main__":
    B, Cin, H, W = 2, 4, 16, 16     # NCHW like the PyTorch module: x = (2, 4, 16, 16)
    Cout = 8                        # in_channels != out_channels -> proj path exercised

    key = jax.random.PRNGKey(0)
    ks = jax.random.split(key, 8)

    params = {
        # conv1: Conv2d(Cin, Cout, k=3, padding='same'), OIHW weights + bias
        "w1": jax.random.normal(ks[0], (Cout, Cin, 3, 3), jnp.float32) * 0.1,
        "b1": jax.random.normal(ks[1], (Cout,), jnp.float32) * 0.1,
        # ChannelNorm2d(Cout): gamma=1, beta=0 (module's deterministic init)
        "g1": jnp.ones((Cout,), jnp.float32),
        "be1": jnp.zeros((Cout,), jnp.float32),
        # conv2: Conv2d(Cout, Cout, k=3, padding='same')
        "w2": jax.random.normal(ks[2], (Cout, Cout, 3, 3), jnp.float32) * 0.1,
        "b2": jax.random.normal(ks[3], (Cout,), jnp.float32) * 0.1,
        "g2": jnp.ones((Cout,), jnp.float32),
        "be2": jnp.zeros((Cout,), jnp.float32),
        # proj: Conv2d(Cin, Cout, k=1)
        "wp": jax.random.normal(ks[4], (Cout, Cin, 1, 1), jnp.float32) * 0.1,
        "bp": jax.random.normal(ks[5], (Cout,), jnp.float32) * 0.1,
    }

    x = jax.random.normal(ks[6], (B, Cin, H, W), jnp.float32)

    out = jax.block_until_ready(filtering_block(x, params))
    ref = _ref_forward(x, params)

    assert out.shape == (B, Cout, H, W)
    max_err = float(jnp.max(jnp.abs(out - ref)))
    # Exact ChannelNorm divide + HIGHEST-precision matmuls on both sides -> tight parity.
    assert jnp.allclose(out, ref, atol=2e-3, rtol=2e-3), max_err

    print("KERNEL_OK")
</pallas_src>

<mosaic_0001>
module attributes {stable_mosaic.version = 11 : i64} {
  func.func @_filtering_block_kernel(%arg0: i32, %arg1: memref<1x4x256xf32, #tpu.memory_space<vmem>>, %arg2: memref<9x256xf32, #tpu.memory_space<vmem>>, %arg3: memref<16x36xf32, #tpu.memory_space<vmem>>, %arg4: memref<8x72xf32, #tpu.memory_space<vmem>>, %arg5: memref<16x4xf32, #tpu.memory_space<vmem>>, %arg6: memref<1x8x256xf32, #tpu.memory_space<vmem>>) attributes {dimension_semantics = [#tpu.dimension_semantics<parallel>], iteration_bounds = array<i64: 2>, scalar_prefetch = 0 : i64, scratch_operands = 0 : i64, tpu.core_type = #tpu.core_type<tc>, window_params = [{transform_indices = @transform_0, window_bounds = array<i64: 1, 4, 256>}, {pipeline_mode = #tpu.pipeline_mode<synchronous>, transform_indices = @transform_1, window_bounds = array<i64: 9, 256>}, {pipeline_mode = #tpu.pipeline_mode<synchronous>, transform_indices = @transform_2, window_bounds = array<i64: 16, 36>}, {pipeline_mode = #tpu.pipeline_mode<synchronous>, transform_indices = @transform_3, window_bounds = array<i64: 8, 72>}, {pipeline_mode = #tpu.pipeline_mode<synchronous>, transform_indices = @transform_4, window_bounds = array<i64: 16, 4>}, {transform_indices = @transform_5, window_bounds = array<i64: 1, 8, 256>}]} {
    %c0 = arith.constant 0 : index
    %c0_0 = arith.constant 0 : index
    %c0_1 = arith.constant 0 : index
    %0 = vector.load %arg1[%c0, %c0_0, %c0_1] : memref<1x4x256xf32, #tpu.memory_space<vmem>>, vector<1x4x256xf32>
    %1 = vector.shape_cast %0 : vector<1x4x256xf32> to vector<4x256xf32>
    %2 = vector.extract_strided_slice %1 {offsets = [0, 239], sizes = [4, 17], strides = [1, 1]} : vector<4x256xf32> to vector<4x17xf32>
    %3 = vector.extract_strided_slice %1 {offsets = [0, 0], sizes = [4, 239], strides = [1, 1]} : vector<4x256xf32> to vector<4x239xf32>
    %4 = tpu.concatenate %2, %3 in 1 : vector<4x17xf32>, vector<4x239xf32> -> vector<4x256xf32>
    %c0_2 = arith.constant 0 : index
    %c0_3 = arith.constant 0 : index
    %5 = vector.load %arg2[%c0_2, %c0_3] : memref<9x256xf32, #tpu.memory_space<vmem>>, vector<1x256xf32>
    %6 = vector.broadcast %5 : vector<1x256xf32> to vector<4x256xf32>
    %7 = arith.mulf %4, %6 : vector<4x256xf32>
    %8 = vector.extract_strided_slice %1 {offsets = [0, 240], sizes = [4, 16], strides = [1, 1]} : vector<4x256xf32> to vector<4x16xf32>
    %9 = vector.extract_strided_slice %1 {offsets = [0, 0], sizes = [4, 240], strides = [1, 1]} : vector<4x256xf32> to vector<4x240xf32>
    %10 = tpu.concatenate %8, %9 in 1 : vector<4x16xf32>, vector<4x240xf32> -> vector<4x256xf32>
    %c1 = arith.constant 1 : index
    %c0_4 = arith.constant 0 : index
    %11 = vector.load %arg2[%c1, %c0_4] : memref<9x256xf32, #tpu.memory_space<vmem>>, vector<1x256xf32>
    %12 = vector.broadcast %11 : vector<1x256xf32> to vector<4x256xf32>
    %13 = arith.mulf %10, %12 : vector<4x256xf32>
    %14 = vector.extract_strided_slice %1 {offsets = [0, 241], sizes = [4, 15], strides = [1, 1]} : vector<4x256xf32> to vector<4x15xf32>
    %15 = vector.extract_strided_slice %1 {offsets = [0, 0], sizes = [4, 241], strides = [1, 1]} : vector<4x256xf32> to vector<4x241xf32>
    %16 = tpu.concatenate %14, %15 in 1 : vector<4x15xf32>, vector<4x241xf32> -> vector<4x256xf32>
    %c2 = arith.constant 2 : index
    %c0_5 = arith.constant 0 : index
    %17 = vector.load %arg2[%c2, %c0_5] : memref<9x256xf32, #tpu.memory_space<vmem>>, vector<1x256xf32>
    %18 = vector.broadcast %17 : vector<1x256xf32> to vector<4x256xf32>
    %19 = arith.mulf %16, %18 : vector<4x256xf32>
    %20 = vector.extract_strided_slice %1 {offsets = [0, 255], sizes = [4, 1], strides = [1, 1]} : vector<4x256xf32> to vector<4x1xf32>
    %21 = vector.extract_strided_slice %1 {offsets = [0, 0], sizes = [4, 255], strides = [1, 1]} : vector<4x256xf32> to vector<4x255xf32>
    %22 = tpu.concatenate %20, %21 in 1 : vector<4x1xf32>, vector<4x255xf32> -> vector<4x256xf32>
    %c3 = arith.constant 3 : index
    %c0_6 = arith.constant 0 : index
    %23 = vector.load %arg2[%c3, %c0_6] : memref<9x256xf32, #tpu.memory_space<vmem>>, vector<1x256xf32>
    %24 = vector.broadcast %23 : vector<1x256xf32> to vector<4x256xf32>
    %25 = arith.mulf %22, %24 : vector<4x256xf32>
    %26 = vector.extract_strided_slice %1 {offsets = [0, 1], sizes = [4, 255], strides = [1, 1]} : vector<4x256xf32> to vector<4x255xf32>
    %27 = vector.extract_strided_slice %1 {offsets = [0, 0], sizes = [4, 1], strides = [1, 1]} : vector<4x256xf32> to vector<4x1xf32>
    %28 = tpu.concatenate %26, %27 in 1 : vector<4x255xf32>, vector<4x1xf32> -> vector<4x256xf32>
    %c5 = arith.constant 5 : index
    %c0_7 = arith.constant 0 : index
    %29 = vector.load %arg2[%c5, %c0_7] : memref<9x256xf32, #tpu.memory_space<vmem>>, vector<1x256xf32>
    %30 = vector.broadcast %29 : vector<1x256xf32> to vector<4x256xf32>
    %31 = arith.mulf %28, %30 : vector<4x256xf32>
    %32 = vector.extract_strided_slice %1 {offsets = [0, 15], sizes = [4, 241], strides = [1, 1]} : vector<4x256xf32> to vector<4x241xf32>
    %33 = vector.extract_strided_slice %1 {offsets = [0, 0], sizes = [4, 15], strides = [1, 1]} : vector<4x256xf32> to vector<4x15xf32>
    %34 = tpu.concatenate %32, %33 in 1 : vector<4x241xf32>, vector<4x15xf32> -> vector<4x256xf32>
    %c6 = arith.constant 6 : index
    %c0_8 = arith.constant 0 : index
    %35 = vector.load %arg2[%c6, %c0_8] : memref<9x256xf32, #tpu.memory_space<vmem>>, vector<1x256xf32>
    %36 = vector.broadcast %35 : vector<1x256xf32> to vector<4x256xf32>
    %37 = arith.mulf %34, %36 : vector<4x256xf32>
    %38 = vector.extract_strided_slice %1 {offsets = [0, 16], sizes = [4, 240], strides = [1, 1]} : vector<4x256xf32> to vector<4x240xf32>
    %39 = vector.extract_strided_slice %1 {offsets = [0, 0], sizes = [4, 16], strides = [1, 1]} : vector<4x256xf32> to vector<4x16xf32>
    %40 = tpu.concatenate %38, %39 in 1 : vector<4x240xf32>, vector<4x16xf32> -> vector<4x256xf32>
    %c7 = arith.constant 7 : index
    %c0_9 = arith.constant 0 : index
    %41 = vector.load %arg2[%c7, %c0_9] : memref<9x256xf32, #tpu.memory_space<vmem>>, vector<1x256xf32>
    %42 = vector.broadcast %41 : vector<1x256xf32> to vector<4x256xf32>
    %43 = arith.mulf %40, %42 : vector<4x256xf32>
    %44 = vector.extract_strided_slice %1 {offsets = [0, 17], sizes = [4, 239], strides = [1, 1]} : vector<4x256xf32> to vector<4x239xf32>
    %45 = vector.extract_strided_slice %1 {offsets = [0, 0], sizes = [4, 17], strides = [1, 1]} : vector<4x256xf32> to vector<4x17xf32>
    %46 = tpu.concatenate %44, %45 in 1 : vector<4x239xf32>, vector<4x17xf32> -> vector<4x256xf32>
    %c8 = arith.constant 8 : index
    %c0_10 = arith.constant 0 : index
    %47 = vector.load %arg2[%c8, %c0_10] : memref<9x256xf32, #tpu.memory_space<vmem>>, vector<1x256xf32>
    %48 = vector.broadcast %47 : vector<1x256xf32> to vector<4x256xf32>
    %49 = arith.mulf %46, %48 : vector<4x256xf32>
    %50 = tpu.concatenate %7, %13, %19, %25, %1, %31, %37, %43, %49 in 0 : vector<4x256xf32>, vector<4x256xf32>, vector<4x256xf32>, vector<4x256xf32>, vector<4x256xf32>, vector<4x256xf32>, vector<4x256xf32>, vector<4x256xf32>, vector<4x256xf32> -> vector<36x256xf32>
    %c0_11 = arith.constant 0 : index
    %c0_12 = arith.constant 0 : index
    %51 = vector.load %arg3[%c0_11, %c0_12] : memref<16x36xf32, #tpu.memory_space<vmem>>, vector<16x36xf32>
    %cst = arith.constant dense<0.000000e+00> : vector<16x256xf32>
    %52 = tpu.matmul %51, %50, %cst {dimension_numbers = #tpu.dot_dimension_numbers<[1], [0], [0], [1], [0, 0, 1, 1], [], []>, precision = #tpu.contract_precision<fp32>} : vector<16x36xf32>, vector<36x256xf32>, vector<16x256xf32> -> vector<16x256xf32>
    %c0_13 = arith.constant 0 : index
    %c0_14 = arith.constant 0 : index
    %53 = vector.load %arg5[%c0_13, %c0_14] : memref<16x4xf32, #tpu.memory_space<vmem>>, vector<16x1xf32>
    %54 = vector.broadcast %53 : vector<16x1xf32> to vector<16x256xf32>
    %55 = arith.addf %52, %54 : vector<16x256xf32>
    %56 = vector.extract_strided_slice %55 {offsets = [0, 0], sizes = [8, 256], strides = [1, 1]} : vector<16x256xf32> to vector<8x256xf32>
    %57 = vector.extract_strided_slice %55 {offsets = [8, 0], sizes = [8, 256], strides = [1, 1]} : vector<16x256xf32> to vector<8x256xf32>
    %c0_15 = arith.constant 0 : index
    %c1_16 = arith.constant 1 : index
    %58 = vector.load %arg5[%c0_15, %c1_16] : memref<16x4xf32, #tpu.memory_space<vmem>>, vector<8x1xf32>
    %c0_17 = arith.constant 0 : index
    %c2_18 = arith.constant 2 : index
    %59 = vector.load %arg5[%c0_17, %c2_18] : memref<16x4xf32, #tpu.memory_space<vmem>>, vector<8x1xf32>
    %cst_19 = arith.constant dense<0.000000e+00> : vector<256xf32>
    %60 = vector.multi_reduction <add>, %56, %cst_19 [0] : vector<8x256xf32> to vector<256xf32>
    %61 = vector.shape_cast %60 : vector<256xf32> to vector<1x256xf32>
    %cst_20 = arith.constant 8.000000e+00 : f32
    %62 = vector.broadcast %cst_20 : f32 to vector<1x256xf32>
    %63 = arith.divf %61, %62 : vector<1x256xf32>
    %64 = vector.broadcast %63 : vector<1x256xf32> to vector<8x256xf32>
    %65 = arith.subf %56, %64 : vector<8x256xf32>
    %66 = arith.mulf %65, %65 : vector<8x256xf32>
    %cst_21 = arith.constant dense<0.000000e+00> : vector<256xf32>
    %67 = vector.multi_reduction <add>, %66, %cst_21 [0] : vector<8x256xf32> to vector<256xf32>
    %68 = vector.shape_cast %67 : vector<256xf32> to vector<1x256xf32>
    %cst_22 = arith.constant 7.000000e+00 : f32
    %69 = vector.broadcast %cst_22 : f32 to vector<1x256xf32>
    %70 = arith.divf %68, %69 : vector<1x256xf32>
    %71 = vector.broadcast %63 : vector<1x256xf32> to vector<8x256xf32>
    %72 = arith.subf %56, %71 : vector<8x256xf32>
    %73 = math.sqrt %70 : vector<1x256xf32>
    %cst_23 = arith.constant 1.000000e-03 : f32
    %74 = vector.broadcast %cst_23 : f32 to vector<1x256xf32>
    %75 = arith.addf %73, %74 : vector<1x256xf32>
    %76 = vector.broadcast %75 : vector<1x256xf32> to vector<8x256xf32>
    %77 = arith.divf %72, %76 : vector<8x256xf32>
    %78 = vector.broadcast %58 : vector<8x1xf32> to vector<8x256xf32>
    %79 = arith.mulf %77, %78 : vector<8x256xf32>
    %80 = vector.broadcast %59 : vector<8x1xf32> to vector<8x256xf32>
    %81 = arith.addf %79, %80 : vector<8x256xf32>
    %cst_24 = arith.constant 0.000000e+00 : f32
    %82 = vector.broadcast %cst_24 : f32 to vector<8x256xf32>
    %83 = arith.maximumf %81, %82 : vector<8x256xf32>
    %84 = vector.extract_strided_slice %83 {offsets = [0, 239], sizes = [8, 17], strides = [1, 1]} : vector<8x256xf32> to vector<8x17xf32>
    %85 = vector.extract_strided_slice %83 {offsets = [0, 0], sizes = [8, 239], strides = [1, 1]} : vector<8x256xf32> to vector<8x239xf32>
    %86 = tpu.concatenate %84, %85 in 1 : vector<8x17xf32>, vector<8x239xf32> -> vector<8x256xf32>
    %c0_25 = arith.constant 0 : index
    %c0_26 = arith.constant 0 : index
    %87 = vector.load %arg2[%c0_25, %c0_26] : memref<9x256xf32, #tpu.memory_space<vmem>>, vector<1x256xf32>
    %88 = vector.broadcast %87 : vector<1x256xf32> to vector<8x256xf32>
    %89 = arith.mulf %86, %88 : vector<8x256xf32>
    %90 = vector.extract_strided_slice %83 {offsets = [0, 240], sizes = [8, 16], strides = [1, 1]} : vector<8x256xf32> to vector<8x16xf32>
    %91 = vector.extract_strided_slice %83 {offsets = [0, 0], sizes = [8, 240], strides = [1, 1]} : vector<8x256xf32> to vector<8x240xf32>
    %92 = tpu.concatenate %90, %91 in 1 : vector<8x16xf32>, vector<8x240xf32> -> vector<8x256xf32>
    %c1_27 = arith.constant 1 : index
    %c0_28 = arith.constant 0 : index
    %93 = vector.load %arg2[%c1_27, %c0_28] : memref<9x256xf32, #tpu.memory_space<vmem>>, vector<1x256xf32>
    %94 = vector.broadcast %93 : vector<1x256xf32> to vector<8x256xf32>
    %95 = arith.mulf %92, %94 : vector<8x256xf32>
    %96 = vector.extract_strided_slice %83 {offsets = [0, 241], sizes = [8, 15], strides = [1, 1]} : vector<8x256xf32> to vector<8x15xf32>
    %97 = vector.extract_strided_slice %83 {offsets = [0, 0], sizes = [8, 241], strides = [1, 1]} : vector<8x256xf32> to vector<8x241xf32>
    %98 = tpu.concatenate %96, %97 in 1 : vector<8x15xf32>, vector<8x241xf32> -> vector<8x256xf32>
    %c2_29 = arith.constant 2 : index
    %c0_30 = arith.constant 0 : index
    %99 = vector.load %arg2[%c2_29, %c0_30] : memref<9x256xf32, #tpu.memory_space<vmem>>, vector<1x256xf32>
    %100 = vector.broadcast %99 : vector<1x256xf32> to vector<8x256xf32>
    %101 = arith.mulf %98, %100 : vector<8x256xf32>
    %102 = vector.extract_strided_slice %83 {offsets = [0, 255], sizes = [8, 1], strides = [1, 1]} : vector<8x256xf32> to vector<8x1xf32>
    %103 = vector.extract_strided_slice %83 {offsets = [0, 0], sizes = [8, 255], strides = [1, 1]} : vector<8x256xf32> to vector<8x255xf32>
    %104 = tpu.concatenate %102, %103 in 1 : vector<8x1xf32>, vector<8x255xf32> -> vector<8x256xf32>
    %c3_31 = arith.constant 3 : index
    %c0_32 = arith.constant 0 : index
    %105 = vector.load %arg2[%c3_31, %c0_32] : memref<9x256xf32, #tpu.memory_space<vmem>>, vector<1x256xf32>
    %106 = vector.broadcast %105 : vector<1x256xf32> to vector<8x256xf32>
    %107 = arith.mulf %104, %106 : vector<8x256xf32>
    %108 = vector.extract_strided_slice %83 {offsets = [0, 1], sizes = [8, 255], strides = [1, 1]} : vector<8x256xf32> to vector<8x255xf32>
    %109 = vector.extract_strided_slice %83 {offsets = [0, 0], sizes = [8, 1], strides = [1, 1]} : vector<8x256xf32> to vector<8x1xf32>
    %110 = tpu.concatenate %108, %109 in 1 : vector<8x255xf32>, vector<8x1xf32> -> vector<8x256xf32>
    %c5_33 = arith.constant 5 : index
    %c0_34 = arith.constant 0 : index
    %111 = vector.load %arg2[%c5_33, %c0_34] : memref<9x256xf32, #tpu.memory_space<vmem>>, vector<1x256xf32>
    %112 = vector.broadcast %111 : vector<1x256xf32> to vector<8x256xf32>
    %113 = arith.mulf %110, %112 : vector<8x256xf32>
    %114 = vector.extract_strided_slice %83 {offsets = [0, 15], sizes = [8, 241], strides = [1, 1]} : vector<8x256xf32> to vector<8x241xf32>
    %115 = vector.extract_strided_slice %83 {offsets = [0, 0], sizes = [8, 15], strides = [1, 1]} : vector<8x256xf32> to vector<8x15xf32>
    %116 = tpu.concatenate %114, %115 in 1 : vector<8x241xf32>, vector<8x15xf32> -> vector<8x256xf32>
    %c6_35 = arith.constant 6 : index
    %c0_36 = arith.constant 0 : index
    %117 = vector.load %arg2[%c6_35, %c0_36] : memref<9x256xf32, #tpu.memory_space<vmem>>, vector<1x256xf32>
    %118 = vector.broadcast %117 : vector<1x256xf32> to vector<8x256xf32>
    %119 = arith.mulf %116, %118 : vector<8x256xf32>
    %120 = vector.extract_strided_slice %83 {offsets = [0, 16], sizes = [8, 240], strides = [1, 1]} : vector<8x256xf32> to vector<8x240xf32>
    %121 = vector.extract_strided_slice %83 {offsets = [0, 0], sizes = [8, 16], strides = [1, 1]} : vector<8x256xf32> to vector<8x16xf32>
    %122 = tpu.concatenate %120, %121 in 1 : vector<8x240xf32>, vector<8x16xf32> -> vector<8x256xf32>
    %c7_37 = arith.constant 7 : index
    %c0_38 = arith.constant 0 : index
    %123 = vector.load %arg2[%c7_37, %c0_38] : memref<9x256xf32, #tpu.memory_space<vmem>>, vector<1x256xf32>
    %124 = vector.broadcast %123 : vector<1x256xf32> to vector<8x256xf32>
    %125 = arith.mulf %122, %124 : vector<8x256xf32>
    %126 = vector.extract_strided_slice %83 {offsets = [0, 17], sizes = [8, 239], strides = [1, 1]} : vector<8x256xf32> to vector<8x239xf32>
    %127 = vector.extract_strided_slice %83 {offsets = [0, 0], sizes = [8, 17], strides = [1, 1]} : vector<8x256xf32> to vector<8x17xf32>
    %128 = tpu.concatenate %126, %127 in 1 : vector<8x239xf32>, vector<8x17xf32> -> vector<8x256xf32>
    %c8_39 = arith.constant 8 : index
    %c0_40 = arith.constant 0 : index
    %129 = vector.load %arg2[%c8_39, %c0_40] : memref<9x256xf32, #tpu.memory_space<vmem>>, vector<1x256xf32>
    %130 = vector.broadcast %129 : vector<1x256xf32> to vector<8x256xf32>
    %131 = arith.mulf %128, %130 : vector<8x256xf32>
    %132 = tpu.concatenate %89, %95, %101, %107, %83, %113, %119, %125, %131 in 0 : vector<8x256xf32>, vector<8x256xf32>, vector<8x256xf32>, vector<8x256xf32>, vector<8x256xf32>, vector<8x256xf32>, vector<8x256xf32>, vector<8x256xf32>, vector<8x256xf32> -> vector<72x256xf32>
    %c0_41 = arith.constant 0 : index
    %c0_42 = arith.constant 0 : index
    %133 = vector.load %arg4[%c0_41, %c0_42] : memref<8x72xf32, #tpu.memory_space<vmem>>, vector<8x72xf32>
    %cst_43 = arith.constant dense<0.000000e+00> : vector<8x256xf32>
    %134 = tpu.matmul %133, %132, %cst_43 {dimension_numbers = #tpu.dot_dimension_numbers<[1], [0], [0], [1], [0, 0, 1, 1], [], []>, precision = #tpu.contract_precision<fp32>} : vector<8x72xf32>, vector<72x256xf32>, vector<8x256xf32> -> vector<8x256xf32>
    %c0_44 = arith.constant 0 : index
    %c3_45 = arith.constant 3 : index
    %135 = vector.load %arg5[%c0_44, %c3_45] : memref<16x4xf32, #tpu.memory_space<vmem>>, vector<8x1xf32>
    %136 = vector.broadcast %135 : vector<8x1xf32> to vector<8x256xf32>
    %137 = arith.addf %134, %136 : vector<8x256xf32>
    %c8_46 = arith.constant 8 : index
    %c1_47 = arith.constant 1 : index
    %138 = vector.load %arg5[%c8_46, %c1_47] : memref<16x4xf32, #tpu.memory_space<vmem>>, vector<8x1xf32>
    %c8_48 = arith.constant 8 : index
    %c2_49 = arith.constant 2 : index
    %139 = vector.load %arg5[%c8_48, %c2_49] : memref<16x4xf32, #tpu.memory_space<vmem>>, vector<8x1xf32>
    %cst_50 = arith.constant dense<0.000000e+00> : vector<256xf32>
    %140 = vector.multi_reduction <add>, %137, %cst_50 [0] : vector<8x256xf32> to vector<256xf32>
    %141 = vector.shape_cast %140 : vector<256xf32> to vector<1x256xf32>
    %cst_51 = arith.constant 8.000000e+00 : f32
    %142 = vector.broadcast %cst_51 : f32 to vector<1x256xf32>
    %143 = arith.divf %141, %142 : vector<1x256xf32>
    %144 = vector.broadcast %143 : vector<1x256xf32> to vector<8x256xf32>
    %145 = arith.subf %137, %144 : vector<8x256xf32>
    %146 = arith.mulf %145, %145 : vector<8x256xf32>
    %cst_52 = arith.constant dense<0.000000e+00> : vector<256xf32>
    %147 = vector.multi_reduction <add>, %146, %cst_52 [0] : vector<8x256xf32> to vector<256xf32>
    %148 = vector.shape_cast %147 : vector<256xf32> to vector<1x256xf32>
    %cst_53 = arith.constant 7.000000e+00 : f32
    %149 = vector.broadcast %cst_53 : f32 to vector<1x256xf32>
    %150 = arith.divf %148, %149 : vector<1x256xf32>
    %151 = vector.broadcast %143 : vector<1x256xf32> to vector<8x256xf32>
    %152 = arith.subf %137, %151 : vector<8x256xf32>
    %153 = math.sqrt %150 : vector<1x256xf32>
    %cst_54 = arith.constant 1.000000e-03 : f32
    %154 = vector.broadcast %cst_54 : f32 to vector<1x256xf32>
    %155 = arith.addf %153, %154 : vector<1x256xf32>
    %156 = vector.broadcast %155 : vector<1x256xf32> to vector<8x256xf32>
    %157 = arith.divf %152, %156 : vector<8x256xf32>
    %158 = vector.broadcast %138 : vector<8x1xf32> to vector<8x256xf32>
    %159 = arith.mulf %157, %158 : vector<8x256xf32>
    %160 = vector.broadcast %139 : vector<8x1xf32> to vector<8x256xf32>
    %161 = arith.addf %159, %160 : vector<8x256xf32>
    %162 = arith.addf %161, %57 : vector<8x256xf32>
    %cst_55 = arith.constant 0.000000e+00 : f32
    %163 = vector.broadcast %cst_55 : f32 to vector<8x256xf32>
    %164 = arith.maximumf %162, %163 : vector<8x256xf32>
    %c0_56 = arith.constant 0 : index
    %c0_57 = arith.constant 0 : index
    %c0_58 = arith.constant 0 : index
    %165 = vector.load %arg6[%c0_56, %c0_57, %c0_58] : memref<1x8x256xf32, #tpu.memory_space<vmem>>, vector<1x8x256xf32>
    %166 = vector.shape_cast %165 : vector<1x8x256xf32> to vector<8x256xf32>
    %167 = vector.shape_cast %164 : vector<8x256xf32> to vector<1x8x256xf32>
    tpu.vector_store %arg6[%c0_56, %c0_57, %c0_58], %167 {strides = array<i32>} : memref<1x8x256xf32, #tpu.memory_space<vmem>>, vector<1x8x256xf32>,
    return
  }
  func.func @transform_0(%arg0: i32) -> (i32, i32, i32) {
    %c0_i32 = arith.constant 0 : i32
    %c0_i32_0 = arith.constant 0 : i32
    %c0_i32_1 = arith.constant 0 : i32
    return %arg0, %c0_i32, %c0_i32_0 : i32, i32, i32
  }
  func.func @transform_1(%arg0: i32) -> (i32, i32) {
    %c0_i32 = arith.constant 0 : i32
    %c0_i32_0 = arith.constant 0 : i32
    %c0_i32_1 = arith.constant 0 : i32
    return %c0_i32, %c0_i32_0 : i32, i32
  }
  func.func @transform_2(%arg0: i32) -> (i32, i32) {
    %c0_i32 = arith.constant 0 : i32
    %c0_i32_0 = arith.constant 0 : i32
    %c0_i32_1 = arith.constant 0 : i32
    return %c0_i32, %c0_i32_0 : i32, i32
  }
  func.func @transform_3(%arg0: i32) -> (i32, i32) {
    %c0_i32 = arith.constant 0 : i32
    %c0_i32_0 = arith.constant 0 : i32
    %c0_i32_1 = arith.constant 0 : i32
    return %c0_i32, %c0_i32_0 : i32, i32
  }
  func.func @transform_4(%arg0: i32) -> (i32, i32) {
    %c0_i32 = arith.constant 0 : i32
    %c0_i32_0 = arith.constant 0 : i32
    %c0_i32_1 = arith.constant 0 : i32
    return %c0_i32, %c0_i32_0 : i32, i32
  }
  func.func @transform_5(%arg0: i32) -> (i32, i32, i32) {
    %c0_i32 = arith.constant 0 : i32
    %c0_i32_0 = arith.constant 0 : i32
    %c0_i32_1 = arith.constant 0 : i32
    return %arg0, %c0_i32, %c0_i32_0 : i32, i32, i32
  }
}

</mosaic_0001>

<bundles_post_ra>
// kernel: tpu_custom_call.1
= control target key start
LH: loop header
LB: loop body
LE: loop exit
PB: predicated region body
PF: predicated region fallthrough
CT: control target
= control target key end

     0   :  { %10 = vsyncpa [#allocation3], 0  ;;  %s3443_s0 = inlined_call_operand.vmem [shape: f32[2,4,256], index: 0, kind: input, shape index: {}]   ;;  %s3444_s1 = inlined_call_operand.hbm [shape: f32[9,256], index: 1, kind: input, shape index: {}]   ;;  %s3445_s2 = inlined_call_operand.hbm [shape: f32[16,36], index: 2, kind: input, shape index: {}]   ;;  %s3446_s3 = inlined_call_operand.vmem [shape: f32[8,72], index: 3, kind: input, shape index: {}]   ;;  %s3447_s4 = inlined_call_operand.vmem [shape: f32[16,4], index: 4, kind: input, shape index: {}]   ;;  %s3448_s5 = inlined_call_operand.hbm [shape: f32[2,8,256], index: 5, kind: output, shape index: {}]  }
   0x1   :  { %11 = vsyncpa [#allocation6], 0 }
   0x2   :  { %12 = vsyncpa [#allocation4], 0 }
   0x3   :  { %14 = vsyncpa [#allocation4 + $0x1], 0  ;;  %s2619_s18 = smov 0   ;;  %s2621_s19 = smov 0  }
   0x4   :  { %s2623_s20 = smov 0   ;;  %s2625_s21 = smov 0  }
   0x5 LB: > { %s2640_s22 = sadd.s32 4294967295, %s2567_s21   ;;  %s2142_s23 = sadd.s32 4294967294, %s2567_s21   ;;  %s2567_s21 = sphi %s2625_s21, %s3494_s21   ;;  %s2563_s20 = sphi %s2623_s20, %s3493_s20   ;;  %s2559_s19 = sphi %s2621_s19, %s3492_s19   ;;  %s2555_s18 = sphi %s2619_s18, %s3491_s18  }
   0x6   : > { %s2644_s24 = sadd.s32 1, %s2567_s21   ;;  %s137_s25 = sadd.s32 1, %s2563_s20 }
   0x7   : > { %s134_s26 = ssub.s32 %s2567_s21, %s2644_s24  ;;  %p147_p0 = scmp.ne.s32.totalorder %s2563_s20, %s2559_s19 }
   0x8   : > { %p135_p1 = scmp.eq.s32.totalorder %s134_s26, 0  ;;  %p148_p2 = scmp.eq.s32.totalorder %s2640_s22, 1 }
   0x9   : > { %p153_p3 = scmp.ne.s32.totalorder %s2559_s19, %s2555_s18  ;;  %p154_p4 = scmp.eq.s32.totalorder %s2142_s23, 1 }
   0xa   : > { %s2655_s27 = scalar_select %p135_p1, %s2563_s20, %s137_s25  }
   0xb   : > { %p2657_p5 = por %p148_p2, %p147_p0  ;;  %p2661_p6 = por %p154_p4, %p153_p3 }
   0xc   : > { %p2143_p7 = scmp.ge.s32.totalorder %s2567_s21, 1  ;;  %p161_p8 = scmp.lt.s32.totalorder %s2567_s21, 3 }
   0xd   : > { %s3466_s28 = scalar_select %p2657_p5, 1, 0 }
   0xe   : > { %s3467_s29 = scalar_select %p2661_p6, 1, 0 }
   0xf   : > { %p3449_p9 = scmp.eq.s32.totalorder %s2640_s22, 0  ;;  %p2668_p10 = pnand %p2143_p7, %p161_p8 }
  0x10   : > { %s2569_s6 = smov [#allocation2]   ;;  %s2570_s9 = smov [#allocation5]  }
  0x11   : > { %s3468_s30 = scalar_select %p2668_p10, 1, 0 }
  0x12   : > { %s173_s7 = sshll.u32 %s2569_s6, 4  ;;  %p2350_p11 = pneg %p2668_p10  ;;  %s174_s7 = int_to_ptr.vmem [resolvable:$true] %s173_s7 }
  0x13   : > { %s186_s10 = sshll.u32 %s2570_s9, 4  ;;  %s2441_s13 = scalar_lea.hbm %s3444_s1, 512  ;;  %s2680_s10 = int_to_ptr.vmem [resolvable:$true] %s186_s10 }
  0x14   : > { %p2676_p12 = pnand %p3449_p9, %p2350_p11  ;;  %p2442_p13 = scmp.ne.s32.totalorder %s3444_s1, %s2441_s13 }
  0x15   : > { %p2448_p3 = scmp.lt.u32.totalorder %s2441_s13, %s3444_s1 }
  0x16   : > { %p2443_p0 = pneg %p2676_p12 }
  0x18   : > { %p2444_p1 = pnand %p2443_p0, %p2442_p13 }
  0x1a   : > { %p2445_p2 = pneg %p2444_p1 }
  0x1c   : > { %p2450_p4 = pnand %p2448_p3, %p2445_p2 }
  0x1e   : > { %2453 = shalt.err (!%p2450_p4)
}
  0x1f   : > { %s2454_s23 = scalar_lea.vmem %s174_s7, 512  ;;  %p2462_p9 = scmp.lt.s32.totalorder %s174_s7, %s174_s7 }
  0x20   : > { %p2455_p7 = scmp.ne.s32.totalorder %s174_s7, %s2454_s23  ;;  %p2463_p6 = scmp.lt.s32.totalorder %s2454_s23, %s2454_s23 }
  0x22   : > { %p2457_p8 = pnand %p2455_p7, %p2443_p0  ;;  %p2464_p5 = por %p2463_p6, %p2462_p9 }
  0x24   : > { %p2458_p11 = pneg %p2457_p8 }
  0x26   : > { %p2465_p10 = pnand %p2464_p5, %p2458_p11 }
  0x28   : > { %2468 = shalt.err (!%p2465_p10)
}
  0x29   : > { %s2571_s25 = smov 256   ;;  %s2572_s26 = smov 16  }
  0x2a   : > { %2353 = dma.hbm_to_vmem [thread:$0]  (!%p2676_p12), %s3444_s1, 512, %s174_s7, [#allocation3], %s2571_s25, %s2571_s25, %s2572_s26  }
  0x2b   : > { %s2469_s13 = scalar_lea.hbm %s3445_s2, 256 }
  0x2c   : > { %p2470_p13 = scmp.ne.s32.totalorder %s3445_s2, %s2469_s13  ;;  %p2476_p9 = scmp.lt.u32.totalorder %s2469_s13, %s3445_s2 }
  0x2e   : > { %p2472_p5 = pnand %p2470_p13, %p2443_p0 }
  0x30   : > { %p2473_p6 = pneg %p2472_p5 }
  0x32   : > { %p2478_p10 = pnand %p2476_p9, %p2473_p6 }
  0x34   : > { %2481 = shalt.err (!%p2478_p10)
}
  0x35   : > { %s2482_s7 = scalar_lea.vmem %s2680_s10, 256  ;;  %p2490_p4 = scmp.lt.s32.totalorder %s2680_s10, %s2680_s10 }
  0x36   : > { %p2483_p1 = scmp.ne.s32.totalorder %s2680_s10, %s2482_s7  ;;  %p2491_p7 = scmp.lt.s32.totalorder %s2482_s7, %s2482_s7 }
  0x38   : > { %p2485_p2 = pnand %p2483_p1, %p2443_p0  ;;  %p2492_p8 = por %p2491_p7, %p2490_p4 }
  0x3a   : > { %p2486_p3 = pneg %p2485_p2 }
  0x3c   : > { %p2493_p11 = pnand %p2492_p8, %p2486_p3 }
  0x3e   : > { %2496 = shalt.err (!%p2493_p11)
}
  0x3f   : > { %s2573_s23 = smov 128   ;;  %s2574_s25 = smov 8  }
  0x40   : > { %2356 = dma.hbm_to_vmem [thread:$0]  (!%p2676_p12), %s3445_s2, 256, %s2680_s10, [#allocation6], %s2573_s23, %s2573_s23, %s2574_s25  }
  0x41   : > { %p3470_p13 = scmp.ne.s32.totalorder %s3468_s30, 0 }
  0x42   : > { %p3471_p0 = scmp.eq.s32.totalorder (!%p3470_p13), %s2640_s22, 0 }
  0x43   : > { %216 = sbr.rel (%p3470_p13) target bundleno = 1106 (0x452), region = 40 }
  0x4a   : > { %2542 = dma.done.wait (%p3471_p0), [#allocation3], 512   ;;  %p3472_p5 = pmov %p3471_p0 }
  0x4b   : > { %p3473_p6 = pmov %p3471_p0 }
  0x4c   : > { %2544 = vsyncadd (%p3472_p5), [#allocation3], 4294966784 }
  0x4d   : > { %2546 = dma.done.wait (%p3473_p6), [#allocation6], 256   ;;  %p3474_p9 = pmov %p3471_p0 }
  0x4e   : > { %p248_p10 = scmp.lt.s32.totalorder %s2640_s22, 1  ;;  %s2575_s12 = smov 1   ;;  %v2582_v2 = vmov 0.0   ;;  %v2787_v3 = vld [vmem:[%s3447_s4] sm:$0xff]  ;;  %v3453_v4 = vmov 0   ;;  %v2585_v5 = vmov 1   ;;  %v268_v7 = vlaneseq }
  0x4f   : > { %2548 = vsyncadd (%p3474_p9), [#allocation6], 4294967040  ;;  %s2576_s13 = smov 16   ;;  %s2577_s14 = smov 17   ;;  %590 = vmatprep.mubr.f32.mxu0 %v2582_v2  ;;  %1551 = vmatprep.mubr.f32.mxu1 %v2582_v2  ;;  %v3452_v6 = vmov 2   ;;  %vm285_vm0 = vcmask 130048  }
  0x50   : > { %s249_s8 = scalar_select %p248_p10, %s2640_s22, 1  ;;  %2417 = vset.pattern.permute.xlu0 %v3453_v4  ;;  %2418 = vset.pattern.permute.xlu1 %v2585_v5  ;;  %v269_v8 = vshrl.u32 %v268_v7, 7  ;;  %v291_v11 = vld [vmem:[#allocation2 + $0x1] ss:$8 sm:$0x3]  ;;  %vm335_vm1 = vcmask 7168  }
  0x51   : > { %s2578_s15 = smov 15   ;;  %s2579_s16 = smov 127   ;;  %v341_v14 = vld [vmem:[#allocation2 + $0x3] ss:$8 sm:$0x3]  ;;  %vm261_vm2 = vcmask 138240  }
  0x52   : > { %s2158_s10 = sshll.u32 %s249_s8, 3  ;;  %s2580_s17 = smov 112   ;;  %v2794_v9 = vsub.s32 0, %v269_v8  ;;  %v2796_v10 = vsub.s32 1, %v269_v8  ;;  %v489_v25 = vld [vmem:[#allocation5] sm:$0xff]  ;;  %vm503_vm3 = vcmask 293888  }
  0x53   : > { %s252_s11 = scalar_lea.vmem %s3443_s0, %s2158_s10  ;;  %s2581_s7 = smov 113   ;;  %v266_v17 = vld [vmem:[#allocation2] ss:$8 sm:$0x3]  ;;  %vm310_vm4 = vcmask 121856   ;;  %vm480_vm5 = vcmask 1043456  }
  0x54   : > { %v2744_v0 = vld [vmem:[%s252_s11] sm:$0xff]  ;;  %s2583_s23 = smov 111   ;;  %v2799_v15 = vrot.slane %v291_v11, %v2794_v9  ;;  %v2802_v16 = vrot.slane %v291_v11, %v2796_v10  ;;  %v2805_v20 = vrot.slane %v341_v14, %v2794_v9  ;;  %v2810_v24 = vrot.slane %v341_v14, %v2796_v10  ;;  %v490_v56 = vld [vmem:[#allocation5 + $0x8] sm:$0xff]  ;;  %s245_s30 = sand.u32 1, %s2559_s19  }
  0x55   : > { %333 = vrot.lane.b32.xlu1 %v2744_v0, %s2575_s12  ;;  %283 = vrot.lane.b32.xlu0 %v2744_v0, %s2576_s13  ;;  %v2752_v1 = vcombine.high %v2744_v0, %v2744_v0  ;;  %v316_v21 = vld [vmem:[#allocation2 + $0x2] ss:$8 sm:$0x3]  ;;  %v2815_v28 = vrot.slane %v266_v17, %v2794_v9  ;;  %v2818_v29 = vrot.slane %v266_v17, %v2796_v10  ;;  %v366_v36 = vld [vmem:[#allocation2 + $0x5] ss:$8 sm:$0x3] }
  0x56   : > { %v2821_v30 = vrot.slane %v316_v21, %v2794_v9  ;;  %v2824_v35 = vrot.slane %v316_v21, %v2796_v10  ;;  %v505_v37 = vsel %vm503_vm3, %v489_v25, 0  ;;  %v416_v42 = vld [vmem:[#allocation2 + $0x7] ss:$8 sm:$0x3]  ;;  %vm359_vm6 = vcmask 1039360   ;;  %s2150_s11 = sshll.u32 %s245_s30, 4 }
  0x57   : > { %v2836_v47 = vrot.slane %v366_v36, %v2794_v9  ;;  %v2839_v48 = vrot.slane %v366_v36, %v2796_v10  ;;  %vm409_vm7 = vcmask 916480   ;;  %v2842_v51 = vrot.slane %v416_v42, %v2794_v9  ;;  %v391_v54 = vld [vmem:[#allocation2 + $0x6] ss:$8 sm:$0x3]  ;;  %p3489_p1 = scmp.ne.s32.totalorder %s3466_s28, 0 }
  0x58   : > { %v2846_v55 = vand.u32 4294901760, %v505_v37  ;;  %v2851_v60 = vrot.slane %v416_v42, %v2796_v10  ;;  %vm384_vm8 = vcmask 924672   ;;  %v2856_v8 = vrot.slane %v391_v54, %v2794_v9 }
  0x59   : > { %259 = vrot.lane.b32.xlu1 %v2744_v0, %s2577_s14  ;;  %280 = vrot.lane.b32.xlu0 %v2752_v1, %s2576_s13  ;;  %v508_v11 = vsel %vm503_vm3, %v490_v56, 0  ;;  %vm434_vm9 = vcmask 908288   ;;  %vm1299_vm14 = vcmask 588800  }
  0x5d   : > { %330 = vrot.lane.b32.xlu1 %v2752_v1, %s2575_s12  ;;  %256 = vrot.lane.b32.xlu0 %v2752_v1, %s2577_s14 }
  0x61   : > { %308 = vrot.lane.b32.xlu1 %v2744_v0, %s2578_s15  ;;  %305 = vrot.lane.b32.xlu0 %v2752_v1, %s2578_s15 }
  0x65   : > { %357 = vrot.lane.b32.xlu1 %v2752_v1, %s2579_s16  ;;  %355 = vrot.lane.b32.xlu0 %v2744_v0, %s2579_s16 }
  0x69   : > { %407 = vrot.lane.b32.xlu1 %v2752_v1, %s2580_s17  ;;  %405 = vrot.lane.b32.xlu0 %v2744_v0, %s2580_s17 }
  0x6d   : > { %382 = vrot.lane.b32.xlu1 %v2752_v1, %s2581_s7  ;;  %380 = vrot.lane.b32.xlu0 %v2744_v0, %s2581_s7 }
  0x71   : > { %432 = vrot.lane.b32.xlu1 %v2752_v1, %s2583_s23  ;;  %430 = vrot.lane.b32.xlu0 %v2744_v0, %s2583_s23 }
  0x75   : > { %495 = vperm.xlu0 %2417, %v2787_v3   ;;  %1191 = vperm.xlu1 %2418, %v2787_v3  }
  0x79   : > { %2419 = vset.pattern.permute.xlu1 %v3452_v6 }
  0x7a   : > { %1197 = vperm.xlu1 %2419, %v2787_v3  }
  0x7e   : > { %2421 = vset.pattern.permute.xlu1 %v2585_v5 }
  0xc7   : > { %v334_v12 = vpop.permute.xlu1 %333  ;;  %v284_v13 = vpop.permute.xlu0 %283 }
  0xcb   : > { %v260_v18 = vpop.permute.xlu1 %259  ;;  %v281_v19 = vpop.permute.xlu0 %280 }
  0xcc   : > { %v286_v22 = vsel %vm285_vm0, %v284_v13, %v281_v19  ;;  %v289_v23 = vsel %vm285_vm0, %v281_v19, %v284_v13  ;;  %v2865_v19 = vsub.f32 %v505_v37, %v2846_v55 }
  0xcd   : > { %v303_v26 = vmul.f32 %v2799_v15, %v289_v23  ;;  %v304_v27 = vmul.f32 %v2802_v16, %v286_v22 }
  0xcf   : > { %v457_v31 = vrot.slane %v303_v26, 4  ;;  %v458_v32 = vrot.slane %v304_v27, 4  ;;  %v331_v33 = vpop.permute.xlu1 %330  ;;  %v257_v34 = vpop.permute.xlu0 %256 }
  0xd0   : > { %v336_v38 = vsel %vm335_vm1, %v334_v12, %v331_v33  ;;  %v339_v39 = vsel %vm335_vm1, %v331_v33, %v334_v12  ;;  %v262_v40 = vsel %vm261_vm2, %v260_v18, %v257_v34  ;;  %v265_v41 = vsel %vm261_vm2, %v257_v34, %v260_v18 }
  0xd1   : > { %v353_v43 = vmul.f32 %v2805_v20, %v339_v39  ;;  %v354_v44 = vmul.f32 %v2810_v24, %v336_v38  ;;  %v278_v45 = vmul.f32 %v2815_v28, %v265_v41  ;;  %v279_v46 = vmul.f32 %v2818_v29, %v262_v40 }
  0xd2   : > { %v2862_v18 = vrot.slane %v391_v54, %v2796_v10 }
  0xd3   : > { %v309_v49 = vpop.permute.xlu1 %308  ;;  %v306_v50 = vpop.permute.xlu0 %305  ;;  %v482_v52 = vsel %vm480_vm5, %v279_v46, %v458_v32  ;;  %v481_v53 = vsel %vm480_vm5, %v278_v45, %v457_v31  ;;  %v463_v57 = vrot.slane %v353_v43, 4  ;;  %v464_v61 = vrot.slane %v354_v44, 4  ;;  %v441_v45 = vld [vmem:[#allocation2 + $0x10] ss:$8 sm:$0x3] }
  0xd4   : > { %v311_v58 = vsel %vm310_vm4, %v309_v49, %v306_v50  ;;  %v314_v59 = vsel %vm310_vm4, %v306_v50, %v309_v49  ;;  %v516_v5 = vand.u32 4294901760, %v482_v52  ;;  %v518_v7 = vand.u32 4294901760, %v481_v53 }
  0xd5   : > { %v328_v62 = vmul.f32 %v2821_v30, %v314_v59  ;;  %v329_v63 = vmul.f32 %v2824_v35, %v311_v58  ;;  %v2873_v32 = vand.u32 4294901760, %v508_v11  ;;  %v3458_v49 = vand.u32 4294901760, %v2865_v19 }
  0xd6   : > { %v2871_v31 = vsub.f32 %v482_v52, %v516_v5  ;;  %v2881_v37 = vsub.f32 %v481_v53, %v518_v7 }
  0xd7   : > { %v358_v12 = vpop.permute.xlu1 %357  ;;  %v356_v13 = vpop.permute.xlu0 %355  ;;  %v484_v14 = vsel %vm480_vm5, %v329_v63, %v464_v61  ;;  %v483_v17 = vsel %vm480_vm5, %v328_v62, %v463_v57  ;;  %v2900_v59 = vsub.f32 %v508_v11, %v2873_v32  ;;  %v2903_v63 = vrot.slane %v441_v45, %v2794_v9 }
  0xd8   : > { %v360_v21 = vsel %vm359_vm6, %v356_v13, %v358_v12  ;;  %v364_v22 = vsel %vm359_vm6, %v358_v12, %v356_v13  ;;  %v520_v23 = vand.u32 4294901760, %v484_v14  ;;  %v522_v25 = vand.u32 4294901760, %v483_v17 }
  0xd9   : > { %v378_v26 = vmul.f32 %v2836_v47, %v360_v21  ;;  %v379_v27 = vmul.f32 %v2839_v48, %v364_v22  ;;  %v615_v57 = vand.u32 4294901760, %v2871_v31  ;;  %v621_v58 = vand.u32 4294901760, %v2881_v37 }
  0xda   : > { %v2875_v33 = vpack.c.bf16 %v520_v23, %v516_v5  ;;  %v2877_v34 = vsub.f32 %v484_v14, %v520_v23  ;;  %v2879_v36 = vpack.c.bf16 %v522_v25, %v518_v7  ;;  %v2883_v42 = vsub.f32 %v483_v17, %v522_v25 }
  0xdb   : > { %v470_v38 = vrot.slane %v378_v26, 4  ;;  %v471_v39 = vrot.slane %v379_v27, 4  ;;  %v408_v40 = vpop.permute.xlu1 %407  ;;  %v406_v41 = vpop.permute.xlu0 %405  ;;  %v2906_v5 = vrot.slane %v441_v45, %v2796_v10  ;;  %v616_v21 = vsub.f32 %v2871_v31, %v615_v57 }
  0xdc   : > { %v410_v43 = vsel %vm409_vm7, %v406_v41, %v408_v40  ;;  %v414_v44 = vsel %vm409_vm7, %v408_v40, %v406_v41  ;;  %2161 = vmatprep.subr.bf16.mxu0 %v2875_v33  ;;  %v627_v46 = vand.u32 4294901760, %v2877_v34  ;;  %v633_v7 = vand.u32 4294901760, %v2883_v42 }
  0xdd   : > { %v428_v50 = vmul.f32 %v2842_v51, %v410_v43  ;;  %v429_v52 = vmul.f32 %v2851_v60, %v414_v44  ;;  %2163 = vmatpush1.bf16.msra.mxu0 %v2879_v36  ;;  %v486_v53 = vsel %vm480_vm5, %v2752_v1, %v471_v39  ;;  %v485_v54 = vsel %vm480_vm5, %v2744_v0, %v470_v38 }
  0xde   : > { %v524_v56 = vand.u32 4294901760, %v486_v53  ;;  %v526_v1 = vand.u32 4294901760, %v485_v54  ;;  %v628_v11 = vsub.f32 %v2877_v34, %v627_v46  ;;  %v594_v22 = vsub.f32 %v2865_v19, %v3458_v49 }
  0xdf   : > { %v383_v61 = vpop.permute.xlu1 %382  ;;  %v381_v62 = vpop.permute.xlu0 %380  ;;  %v476_v14 = vrot.slane %v428_v50, 4  ;;  %v477_v17 = vrot.slane %v429_v52, 4  ;;  %v622_v23 = vsub.f32 %v2881_v37, %v621_v58  ;;  %v3454_v25 = vand.u32 4294901760, %v2900_v59 }
  0xe0   : > { %v385_v0 = vsel %vm384_vm8, %v381_v62, %v383_v61  ;;  %v389_v12 = vsel %vm384_vm8, %v383_v61, %v381_v62  ;;  %v2911_v13 = vsub.f32 %v486_v53, %v524_v56  ;;  %v2930_v40 = vsub.f32 %v485_v54, %v526_v1 }
  0xe1   : > { %v403_v9 = vmul.f32 %v2856_v8, %v385_v0  ;;  %v404_v10 = vmul.f32 %v2862_v18, %v389_v12  ;;  %v629_v61 = vand.u32 4294901760, %v628_v11  ;;  %v634_v62 = vsub.f32 %v2883_v42, %v633_v7 }
  0xe2   : > { %v3456_v41 = vand.u32 4294901760, %v2911_v13 }
  0xe3   : > { %v433_v26 = vpop.permute.xlu1 %432  ;;  %v431_v27 = vpop.permute.xlu0 %430  ;;  %v488_v38 = vsel %vm480_vm5, %v404_v10, %v477_v17  ;;  %v487_v39 = vsel %vm480_vm5, %v403_v9, %v476_v14  ;;  %v645_v10 = vand.u32 4294901760, %v2930_v40 }
  0xe4   : > { %v435_v43 = vsel %vm434_vm9, %v431_v27, %v433_v26  ;;  %v439_v44 = vsel %vm434_vm9, %v433_v26, %v431_v27  ;;  %v528_v45 = vand.u32 4294901760, %v488_v38  ;;  %v530_v50 = vand.u32 4294901760, %v487_v39 }
  0xe5   : > { %v453_v52 = vmul.f32 %v2903_v63, %v435_v43  ;;  %v454_v53 = vmul.f32 %v2906_v5, %v439_v44  ;;  %v640_v11 = vsub.f32 %v2911_v13, %v3456_v41  ;;  %v635_v43 = vand.u32 4294901760, %v634_v62 }
  0xe6   : > { %v2940_v0 = vpack.c.bf16 %v528_v45, %v524_v56  ;;  %v2942_v54 = vsub.f32 %v488_v38, %v528_v45  ;;  %v2944_v12 = vpack.c.bf16 %v530_v50, %v526_v1  ;;  %v2946_v14 = vsub.f32 %v487_v39, %v530_v50 }
  0xe7   : > { %v511_v17 = vsel %vm480_vm5, %v453_v52, 0  ;;  %v514_v9 = vsel %vm480_vm5, %v454_v53, 0  ;;  %v617_v38 = vand.u32 4294901760, %v616_v21  ;;  %v595_v39 = vand.u32 4294901760, %v594_v22 }
  0xe8   : > { %v2954_v26 = vand.u32 4294901760, %v514_v9  ;;  %v2956_v56 = vand.u32 4294901760, %v511_v17  ;;  %2165 = vmatprep.subr.bf16.mxu0 %v2940_v0  ;;  %v3455_v1 = vand.u32 4294901760, %v2942_v54  ;;  %v3457_v27 = vand.u32 4294901760, %v2946_v14 }
  0xe9   : > { %2167 = vmatpush1.bf16.msra.mxu0 %v2944_v12  ;;  %v605_v44 = vsub.f32 %v2900_v59, %v3454_v25  ;;  %v623_v22 = vand.u32 4294901760, %v622_v23  ;;  %v646_v53 = vsub.f32 %v2930_v40, %v645_v10  ;;  %v2168_v62 = vpack.c.bf16 %v629_v61, %v617_v38 }
  0xea   : > { %v2966_v45 = vsub.f32 %v514_v9, %v2954_v26  ;;  %v2969_v50 = vsub.f32 %v511_v17, %v2956_v56  ;;  %533 = vmatprep.subr.mxu0 %v2954_v26  ;;  %v652_v52 = vsub.f32 %v2942_v54, %v3455_v1  ;;  %v658_v21 = vsub.f32 %v2946_v14, %v3457_v27 }
  0xeb   : > { %v641_v9 = vand.u32 4294901760, %v640_v11  ;;  %v2170_v4 = vpack.c.bf16 %v635_v43, %v623_v22  ;;  %v606_v27 = vand.u32 4294901760, %v605_v44  ;;  %v647_v49 = vand.u32 4294901760, %v646_v53 }
  0xec   : > { %v653_v6 = vand.u32 4294901760, %v652_v52  ;;  %v663_v17 = vand.u32 4294901760, %v2966_v45  ;;  %v659_v25 = vand.u32 4294901760, %v658_v21  ;;  %v669_v1 = vand.u32 4294901760, %v2969_v50 }
  0xed   : > { %535 = vmatpush1.msra.mxu0 %v2956_v56  ;;  %v3476_v44 = vand.u32 4294901760, %v2911_v13 }
  0xee   : > { %2169 = vmatprep.subr.bf16.mxu0 %v2168_v62  ;;  %596 = vmatmul.mubr.f32.vlgmr.msra.gmra.mrb[0].mxu0 %v595_v39  ;;  %v2172_v41 = vpack.c.bf16 %v653_v6, %v641_v9  ;;  %v664_v23 = vsub.f32 %v2966_v45, %v663_v17  ;;  %v2174_v61 = vpack.c.bf16 %v659_v25, %v647_v49  ;;  %v3475_v39 = vand.u32 4294901760, %v2865_v19 }
  0xef   : > { %2171 = vmatpush1.bf16.msra.mxu0 %v2170_v4  ;;  %601 = vmatprep.mubr.f32.mxu0 %v2582_v2  ;;  %v670_v11 = vsub.f32 %v2969_v50, %v669_v1  ;;  %v2176_v6 = vpack.c.bf16 %v2877_v34, %v2871_v31  ;;  %v2178_v4 = vpack.c.bf16 %v2883_v42, %v2881_v37  ;;  %v3478_v31 = vand.u32 4294901760, %v2946_v14 }
  0xf0   : > { %2173 = vmatprep.subr.bf16.mxu0 %v2172_v41  ;;  %v665_v38 = vand.u32 4294901760, %v664_v23  ;;  %v2180_v49 = vpack.c.bf16 %v2942_v54, %v2911_v13  ;;  %v2182_v25 = vpack.c.bf16 %v2946_v14, %v2930_v40  ;;  %v2192_v41 = vpack.c.bf16 %v627_v46, %v615_v57 }
  0xf1   : > { %v671_v43 = vand.u32 4294901760, %v670_v11  ;;  %v2198_v34 = vpack.c.bf16 %v3478_v31, %v645_v10  ;;  %v3479_v37 = vand.u32 4294901760, %v2900_v59 }
  0xf2   : > { %607 = vmatmul.mubr.f32.gmra.mrb[2].mxu0 %v606_v27  ;;  %v2194_v27 = vpack.c.bf16 %v633_v7, %v621_v58 }
  0xf3   : > { %2175 = vmatpush1.bf16.msra.mxu0 %v2174_v61  ;;  %727 = vmatprep.mubr.f32.mxu0 %v2582_v2 }
  0xf4   : > { %666 = vmatprep.subr.mxu0 %v665_v38 }
  0xf7   : > { %672 = vmatpush1.msra.mxu0 %v671_v43 }
  0xf8   : > { %2177 = vmatprep.subr.bf16.mxu0 %v2176_v6  ;;  %729 = vmatmul.mubr.f32.vlgmr.msra.gmra.mrb[0].mxu0 %v2846_v55 }
  0xf9   : > { %2179 = vmatpush1.bf16.msra.mxu0 %v2178_v4  ;;  %734 = vmatprep.mubr.f32.mxu0 %v2582_v2 }
  0xfa   : > { %2181 = vmatprep.subr.bf16.mxu0 %v2180_v49 }
  0xfc   : > { %736 = vmatmul.mubr.f32.gmra.mrb[2].mxu0 %v2873_v32 }
  0xfd   : > { %2183 = vmatpush1.bf16.msra.mxu0 %v2182_v25  ;;  %826 = vmatprep.mubr.f32.mxu0 %v2582_v2 }
  0xfe   : > { %768 = vmatprep.subr.mxu0 %v2966_v45  ;;  %v3477_v45 = vand.u32 4294901760, %v2942_v54 }
 0x101   : > { %771 = vmatpush1.msra.mxu0 %v2969_v50  ;;  %v2196_v50 = vpack.c.bf16 %v3477_v45, %v3476_v44 }
 0x102   : > { %2185 = vmatprep.subr.bf16.mxu0 %v2875_v33  ;;  %829 = vmatmul.mubr.f32.vlgmr.msra.gmra.mrb[0].mxu0 %v2865_v19  ;;  %v496_v19 = vpop.permute.xlu0 %495 }
 0x103   : > { %2187 = vmatpush1.bf16.msra.mxu0 %v2879_v36  ;;  %834 = vmatprep.mubr.f32.mxu0 %v2582_v2 }
 0x104   : > { %2189 = vmatprep.subr.bf16.mxu0 %v2940_v0 }
 0x106   : > { %837 = vmatmul.mubr.f32.gmra.mrb[2].mxu0 %v2900_v59 }
 0x107   : > { %2191 = vmatpush1.bf16.msra.mxu0 %v2944_v12  ;;  %917 = vmatprep.mubr.f32.mxu0 %v2582_v2 }
 0x108   : > { %860 = vmatprep.subr.mxu0 %v2954_v26 }
 0x10b   : > { %862 = vmatpush1.msra.mxu0 %v2956_v56 }
 0x10c   : > { %2193 = vmatprep.subr.bf16.mxu0 %v2192_v41  ;;  %921 = vmatmul.mubr.f32.vlgmr.msra.gmra.mrb[0].mxu0 %v3475_v39 }
 0x10d   : > { %2195 = vmatpush1.bf16.msra.mxu0 %v2194_v27  ;;  %926 = vmatprep.mubr.f32.mxu0 %v2582_v2 }
 0x10e   : > { %2197 = vmatprep.subr.bf16.mxu0 %v2196_v50 }
 0x110   : > { %930 = vmatmul.mubr.f32.gmra.mrb[2].mxu0 %v3479_v37 }
 0x111   : > { %2199 = vmatpush1.bf16.msra.mxu0 %v2198_v34  ;;  %1030 = vmatprep.mubr.f32.mxu0 %v2582_v2 }
 0x112   : > { %971 = vmatprep.subr.mxu0 %v663_v17 }
 0x115   : > { %975 = vmatpush1.msra.mxu0 %v669_v1 }
 0x116   : > { %2201 = vmatprep.subr.bf16.mxu0 %v2875_v33  ;;  %1032 = vmatmul.mubr.f32.vlgmr.msra.gmra.mrb[0].mxu0 %v2846_v55 }
 0x117   : > { %2203 = vmatpush1.bf16.msra.mxu0 %v2879_v36  ;;  %1037 = vmatprep.mubr.f32.mxu0 %v2582_v2 }
 0x118   : > { %2205 = vmatprep.subr.bf16.mxu0 %v2940_v0 }
 0x11a   : > { %1039 = vmatmul.mubr.f32.gmra.mrb[2].mxu0 %v2873_v32 }
 0x11b   : > { %2207 = vmatpush1.bf16.msra.mxu0 %v2944_v12  ;;  %1119 = vmatprep.mubr.f32.mxu0 %v2582_v2 }
 0x11c   : > { %1062 = vmatprep.subr.mxu0 %v2954_v26 }
 0x11f   : > { %1064 = vmatpush1.msra.mxu0 %v2956_v56 }
 0x120   : > { %1121 = vmatmul.mubr.f32.vlgmr.msra.gmra.mrb[0].mxu0 %v2846_v55 }
 0x121   : > { %1126 = vmatprep.mubr.f32.mxu0 %v2582_v2 }
 0x124   : > { %1128 = vmatmul.mubr.f32.gmra.mrb[2].mxu0 %v2873_v32 }
 0x125   : > { %1385 = vmatprep.mubr.f32.mxu0 %v2582_v2 }
 0x1f3   : > { %v1122_v33 = vpop.f32.mrb[0].mxu0 }
 0x1f4   : > { %v2304_v36 = vadd.f32 %v1122_v33, %v496_v19  ;;  %v1124_v42 = vpop.f32.mrb[1].mxu0 }
 0x1f5   : > { %v2305_v46 = vadd.f32 %v1124_v42, %v496_v19 }
 0x1f6   : > { %v1135_v57 = vrot.slane %v2304_v36, 4 }
 0x1f7   : > { %v1141_v58 = vrot.slane %v2305_v46, 4  ;;  %v3048_v59 = vpop.f32.mrb[2].mxu0 }
 0x1f8   : > { %v1136_v7 = vadd.f32 %v2304_v36, %v1135_v57  ;;  %v3050_v13 = vpop.f32.mrb[3].mxu0  ;;  %v1192_v57 = vpop.permute.xlu1 %1191 }
 0x1f9   : > { %v1142_v40 = vadd.f32 %v2305_v46, %v1141_v58 }
 0x1fa   : > { %v1137_v55 = vrot.slane %v1136_v7, 2 }
 0x1fb   : > { %v1143_v0 = vrot.slane %v1142_v40, 2 }
 0x1fc   : > { %v1138_v54 = vadd.f32 %v1137_v55, %v1136_v7 }
 0x1fd   : > { %v1144_v12 = vadd.f32 %v1143_v0, %v1142_v40  ;;  %v1198_v0 = vpop.permute.xlu1 %1197 }
 0x1fe   : > { %v1139_v32 = vrot.slane %v1138_v54, 1 }
 0x1ff   : > { %v1145_v14 = vrot.slane %v1144_v12, 1 }
 0x200   : > { %v1140_v10 = vadd.f32 %v1139_v32, %v1138_v54 }
 0x201   : > { %v1146_v26 = vadd.f32 %v1145_v14, %v1144_v12 }
 0x202   : > { %v1148_v56 = vmul.f32 0.125, %v1140_v10 }
 0x203   : > { %v1149_v1 = vmul.f32 0.125, %v1146_v26 }
 0x204   : > { %v1150_v52 = vsub.f32 %v2304_v36, %v1148_v56  ;;  %v492_v56 = vld [vmem:[%s3447_s4 + $0x8] sm:$0xff] }
 0x205   : > { %v1151_v21 = vsub.f32 %v2305_v46, %v1149_v1  ;;  %v3480_v1 = vmov 0  }
 0x206   : > { %v1152_v22 = vmul.f32 %v1150_v52, %v1150_v52 }
 0x207   : > { %v1153_v53 = vmul.f32 %v1151_v21, %v1151_v21 }
 0x208   : > { %v1154_v62 = vrot.slane %v1152_v22, 4 }
 0x209   : > { %v1160_v9 = vrot.slane %v1153_v53, 4 }
 0x20a   : > { %v1155_v17 = vadd.f32 %v1154_v62, %v1152_v22  ;;  %v1294_v22 = vld [vmem:[%s3446_s3] sm:$0xff] }
 0x20b   : > { %v1161_v23 = vadd.f32 %v1160_v9, %v1153_v53 }
 0x20c   : > { %v1156_v61 = vrot.slane %v1155_v17, 2 }
 0x20d   : > { %v1162_v11 = vrot.slane %v1161_v23, 2 }
 0x20e   : > { %v1157_v38 = vadd.f32 %v1156_v61, %v1155_v17  ;;  %v1301_v61 = vsel %vm1299_vm14, %v1294_v22, 0 }
 0x20f   : > { %v1163_v43 = vadd.f32 %v1162_v11, %v1161_v23  ;;  %v3481_v23 = vmov 2  }
 0x210   : > { %v1158_v6 = vrot.slane %v1157_v38, 1 }
 0x211   : > { %v1164_v4 = vrot.slane %v1163_v43, 1 }
 0x212   : > { %v1159_v49 = vadd.f32 %v1158_v6, %v1157_v38 }
 0x213   : > { %v1165_v25 = vadd.f32 %v1164_v4, %v1163_v43 }
 0x214   : > { %v1167_v41 = vmul.f32 0.14285715, %v1159_v49  ;;  %v3114_v49 = vand.u32 4294901760, %v1301_v61 }
 0x215   : > { %v1168_v27 = vmul.f32 0.14285715, %v1165_v25 }
 0x216   : > { %2425 = vrsqrt.f32 %v1167_v41  ;;  %vm1171_vm10 = vcmp.eq.f32.partialorder %v1167_v41, inf  ;;  %v1174_v50 = vand.u32 2147483648, %v1167_v41  ;;  %vm1173_vm11 = vcmp.eq.f32.partialorder %v1167_v41, 0.0 }
 0x217   : > { %2427 = vrsqrt.f32 %v1168_v27  ;;  %vm1178_vm12 = vcmp.eq.f32.partialorder %v1168_v27, inf  ;;  %v1181_v37 = vand.u32 2147483648, %v1168_v27  ;;  %vm1180_vm13 = vcmp.eq.f32.partialorder %v1168_v27, 0.0 }
 0x220   : > { %v2426_v39 = vpop.eup %2425 }
 0x221   : > { %v2428_v44 = vpop.eup %2427  ;;  %v1170_v45 = vmul.f32 %v2426_v39, %v1167_v41 }
 0x222   : > { %v1177_v31 = vmul.f32 %v2428_v44, %v1168_v27 }
 0x223   : > { %v1172_v34 = vsel %vm1171_vm10, %v1167_v41, %v1170_v45 }
 0x224   : > { %v1175_v19 = vsel %vm1173_vm11, %v1174_v50, %v1172_v34  ;;  %v1179_v33 = vsel %vm1178_vm12, %v1168_v27, %v1177_v31  ;;  %v3119_v27 = vsub.f32 %v1301_v61, %v3114_v49 }
 0x225   : > { %v1182_v36 = vsel %vm1180_vm13, %v1181_v37, %v1179_v33  ;;  %v1183_v42 = vadd.f32 0.001, %v1175_v19 }
 0x226   : > { %v1184_v46 = vadd.f32 0.001, %v1182_v36 }
 0x227   : > { %2429 = vrcp.f32 %v1183_v42 }
 0x228   : > { %2431 = vrcp.f32 %v1184_v46 }
 0x231   : > { %v2430_v58 = vpop.eup %2429 }
 0x232   : > { %v2432_v7 = vpop.eup %2431  ;;  %v1186_v40 = vmul.f32 %v2430_v58, %v1150_v52  ;;  %v2587_v52 = vmov 3  }
 0x233   : > { %v1188_v55 = vmul.f32 %v2432_v7, %v1151_v21  ;;  %2420 = vset.pattern.permute.xlu0 %v2587_v52 }
 0x234   : > { %v1194_v54 = vmul.f32 %v1192_v57, %v1186_v40 }
 0x235   : > { %v1195_v12 = vmul.f32 %v1192_v57, %v1188_v55 }
 0x236   : > { %v1200_v32 = vadd.f32 %v1198_v0, %v1194_v54 }
 0x237   : > { %v1201_v14 = vadd.f32 %v1198_v0, %v1195_v12 }
 0x238   : > { %v3052_v10 = vmax.f32 %v1200_v32, 0.0 }
 0x239   : > { %v3058_v26 = vmax.f32 %v1201_v14, 0.0 }
 0x23a   : > { %1250 = vrot.lane.b32.xlu0 %v3052_v10, %s2579_s16  ;;  %1209 = vrot.lane.b32.xlu1 %v3052_v10, %s2577_s14  ;;  %v1321_v9 = vand.u32 4294901760, %v3052_v10 }
 0x23b   : > { %v1319_v21 = vand.u32 4294901760, %v3058_v26 }
 0x23c   : > { %v3109_v38 = vsub.f32 %v3052_v10, %v1321_v9 }
 0x23d   : > { %v3103_v17 = vsub.f32 %v3058_v26, %v1319_v21 }
 0x23e   : > { %1205 = vrot.lane.b32.xlu0 %v3058_v26, %s2577_s14  ;;  %1220 = vrot.lane.b32.xlu1 %v3052_v10, %s2576_s13  ;;  %v3459_v31 = vand.u32 4294901760, %v3109_v38 }
 0x23f   : > { %v1447_v4 = vand.u32 4294901760, %v3103_v17 }
 0x241   : > { %v3127_v19 = vsub.f32 %v3103_v17, %v1447_v4 }
 0x242   : > { %1217 = vrot.lane.b32.xlu0 %v3058_v26, %s2576_s13  ;;  %1231 = vrot.lane.b32.xlu1 %v3052_v10, %s2578_s15  ;;  %s247_s13 = scalar_lea.vmem [#allocation7], %s2150_s11 }
 0x243   : > { %s2061_s14 = sshll.u32 %s247_s13, 4  ;;  %s3403_s14 = int_to_ptr.vmem [resolvable:$true] %s2061_s14 }
 0x246   : > { %1228 = vrot.lane.b32.xlu0 %v3058_v26, %s2578_s15  ;;  %1242 = vrot.lane.b32.xlu1 %v3052_v10, %s2575_s12 }
 0x24a   : > { %1239 = vrot.lane.b32.xlu0 %v3058_v26, %s2575_s12  ;;  %1252 = vrot.lane.b32.xlu1 %v3058_v26, %s2579_s16  ;;  %s2159_s12 = sshll.u32 %s2640_s22, 8  ;;  %s2588_s22 = smov [#allocation7]  }
 0x24b   : > { %s2501_s25 = sshll.u32 %s2588_s22, 4  ;;  %s2502_s25 = int_to_ptr.vmem [resolvable:$false] %s2501_s25 }
 0x24c   : > { %s2503_s26 = scalar_lea.vmem %s2502_s25, 512  ;;  %p2504_p4 = scmp.lt.s32.totalorder %s3403_s14, %s2502_s25 }
 0x24e   : > { %1261 = vrot.lane.b32.xlu0 %v3052_v10, %s2581_s7  ;;  %1263 = vrot.lane.b32.xlu1 %v3058_v26, %s2581_s7  ;;  %s2047_s7 = scalar_lea.sflag [#allocation4], %s245_s30 }
 0x252   : > { %1272 = vrot.lane.b32.xlu0 %v3052_v10, %s2580_s17  ;;  %1274 = vrot.lane.b32.xlu1 %v3058_v26, %s2580_s17  ;;  %s3401_s17 = scalar_lea.hbm %s3448_s5, %s2159_s12 }
 0x256   : > { %1283 = vrot.lane.b32.xlu0 %v3052_v10, %s2583_s23  ;;  %1285 = vrot.lane.b32.xlu1 %v3058_v26, %s2583_s23  ;;  %s2497_s23 = scalar_lea.vmem %s3403_s14, 256 }
 0x257   : > { %p2498_p12 = scmp.ne.s32.totalorder %s3403_s14, %s2497_s23  ;;  %p2505_p7 = scmp.lt.s32.totalorder %s2503_s26, %s2497_s23 }
 0x259   : > { %p2499_p2 = pnand %p2498_p12, %p3489_p1  ;;  %p2506_p8 = por %p2505_p7, %p2504_p4 }
 0x25a   : > { %2029 = vperm.xlu1 %2421, %v492_v56   ;;  %1296 = vperm.xlu0 %2420, %v2787_v3  }
 0x25b   : > { %p2500_p3 = pneg %p2499_p2 }
 0x25d   : > { %p2507_p11 = pnand %p2506_p8, %p2500_p3 }
 0x25e   : > { %2422 = vset.pattern.permute.xlu1 %v3480_v1  ;;  %2423 = vset.pattern.permute.xlu0 %v3481_v23 }
 0x25f   : > { %500 = vperm.xlu1 %2422, %v492_v56   ;;  %2035 = vperm.xlu0 %2423, %v492_v56  }
 0x2ac   : > { %v3097_v53 = vpop.permute.xlu0 %1250  ;;  %v1210_v62 = vpop.permute.xlu1 %1209 }
 0x2b0   : > { %v1206_v3 = vpop.permute.xlu0 %1205  ;;  %v1221_v11 = vpop.permute.xlu1 %1220 }
 0x2b1   : > { %v1211_v43 = vsel %vm261_vm2, %v1210_v62, %v1206_v3  ;;  %v1214_v6 = vsel %vm261_vm2, %v1206_v3, %v1210_v62 }
 0x2b2   : > { %v1215_v25 = vmul.f32 %v1214_v6, %v2815_v28  ;;  %v1216_v41 = vmul.f32 %v1211_v43, %v2818_v29  ;;  %v1388_v28 = vand.u32 4294901760, %v3119_v27 }
 0x2b4   : > { %v1303_v39 = vand.u32 4294901760, %v1216_v41  ;;  %v1305_v44 = vand.u32 4294901760, %v1215_v25  ;;  %v1218_v45 = vpop.permute.xlu0 %1217  ;;  %v1232_v50 = vpop.permute.xlu1 %1231  ;;  %v3139_v46 = vsub.f32 %v3119_v27, %v1388_v28 }
 0x2b5   : > { %v1222_v34 = vsel %vm285_vm0, %v1221_v11, %v1218_v45  ;;  %v1225_v37 = vsel %vm285_vm0, %v1218_v45, %v1221_v11 }
 0x2b6   : > { %v3130_v29 = vsub.f32 %v1216_v41, %v1303_v39  ;;  %v3132_v33 = vsub.f32 %v1215_v25, %v1305_v44  ;;  %v1226_v36 = vmul.f32 %v1225_v37, %v2799_v15  ;;  %v1227_v42 = vmul.f32 %v1222_v34, %v2802_v16 }
 0x2b7   : > { %v1449_v15 = vand.u32 4294901760, %v3127_v19  ;;  %v3149_v16 = vsub.f32 %v3109_v38, %v3459_v31  ;;  %v1390_v23 = vand.u32 4294901760, %v3139_v46 }
 0x2b8   : > { %v1307_v57 = vand.u32 4294901760, %v1227_v42  ;;  %v1309_v58 = vand.u32 4294901760, %v1226_v36  ;;  %v1229_v7 = vpop.permute.xlu0 %1228  ;;  %v1243_v40 = vpop.permute.xlu1 %1242  ;;  %v1399_v55 = vand.u32 4294901760, %v3130_v29  ;;  %v1405_v0 = vand.u32 4294901760, %v3132_v33 }
 0x2b9   : > { %v1233_v54 = vsel %vm310_vm4, %v1232_v50, %v1229_v7  ;;  %v1236_v12 = vsel %vm310_vm4, %v1229_v7, %v1232_v50 }
 0x2ba   : > { %v3151_v32 = vpack.c.bf16 %v1309_v58, %v1305_v44  ;;  %v3153_v14 = vsub.f32 %v1227_v42, %v1307_v57  ;;  %v3155_v56 = vsub.f32 %v1226_v36, %v1309_v58  ;;  %v1237_v1 = vmul.f32 %v1236_v12, %v2821_v30 }
 0x2bb   : > { %v1238_v52 = vmul.f32 %v1233_v54, %v2824_v35  ;;  %v3159_v22 = vpack.c.bf16 %v1307_v57, %v1303_v39  ;;  %v1400_v62 = vsub.f32 %v3130_v29, %v1399_v55  ;;  %v3169_v6 = vsub.f32 %v3132_v33, %v1405_v0 }
 0x2bc   : > { %v1313_v61 = vand.u32 4294901760, %v1237_v1  ;;  %v1240_v3 = vpop.permute.xlu0 %1239  ;;  %v1253_v11 = vpop.permute.xlu1 %1252  ;;  %v1411_v43 = vand.u32 4294901760, %v3153_v14  ;;  %v1417_v30 = vand.u32 4294901760, %v3155_v56 }
 0x2bd   : > { %v1311_v35 = vand.u32 4294901760, %v1238_v52  ;;  %v1244_v25 = vsel %vm335_vm1, %v1243_v40, %v1240_v3  ;;  %v1247_v41 = vsel %vm335_vm1, %v1240_v3, %v1243_v40  ;;  %2209 = vmatprep.subr.bf16.mxu0 %v3159_v22  ;;  %v1254_v39 = vsel %vm359_vm6, %v3097_v53, %v1253_v11 }
 0x2be   : > { %v3177_v44 = vsub.f32 %v1237_v1, %v1313_v61  ;;  %v1248_v45 = vmul.f32 %v1247_v41, %v2805_v20  ;;  %v1249_v50 = vmul.f32 %v1244_v25, %v2810_v24  ;;  %v1258_v34 = vsel %vm359_vm6, %v1253_v11, %v3097_v53  ;;  %2211 = vmatpush1.bf16.msra.mxu0 %v3151_v32 }
 0x2bf   : > { %v3184_v37 = vsub.f32 %v1238_v52, %v1311_v35  ;;  %v1259_v36 = vmul.f32 %v1254_v39, %v2836_v47  ;;  %v1260_v42 = vmul.f32 %v1258_v34, %v2839_v48  ;;  %v1401_v57 = vand.u32 4294901760, %v1400_v62 }
 0x2c0   : > { %v1315_v58 = vand.u32 4294901760, %v1249_v50  ;;  %v1317_v7 = vand.u32 4294901760, %v1248_v45  ;;  %v1262_v40 = vpop.permute.xlu0 %1261  ;;  %v1264_v54 = vpop.permute.xlu1 %1263  ;;  %v1412_v20 = vsub.f32 %v3153_v14, %v1411_v43  ;;  %v1407_v24 = vand.u32 4294901760, %v3169_v6 }
 0x2c1   : > { %v1323_v53 = vand.u32 4294901760, %v1260_v42  ;;  %v1325_v12 = vand.u32 4294901760, %v1259_v36  ;;  %v1265_v1 = vsel %vm384_vm8, %v1262_v40, %v1264_v54  ;;  %v1269_v52 = vsel %vm384_vm8, %v1264_v54, %v1262_v40 }
 0x2c2   : > { %v3194_v47 = vpack.c.bf16 %v1317_v7, %v1313_v61  ;;  %v3196_v48 = vsub.f32 %v1249_v50, %v1315_v58  ;;  %v3198_v62 = vsub.f32 %v1248_v45, %v1317_v7  ;;  %v1270_v3 = vmul.f32 %v1265_v1, %v2856_v8 }
 0x2c3   : > { %v3203_v11 = vpack.c.bf16 %v1325_v12, %v1321_v9  ;;  %v3205_v25 = vsub.f32 %v1260_v42, %v1323_v53  ;;  %v3207_v6 = vsub.f32 %v1259_v36, %v1325_v12  ;;  %v1271_v41 = vmul.f32 %v1269_v52, %v2862_v18 }
 0x2c4   : > { %v1329_v39 = vand.u32 4294901760, %v1270_v3  ;;  %v1273_v34 = vpop.permute.xlu0 %1272  ;;  %v3210_v61 = vpack.c.bf16 %v1315_v58, %v1311_v35  ;;  %v1413_v50 = vand.u32 4294901760, %v1412_v20  ;;  %v1275_v40 = vpop.permute.xlu1 %1274  ;;  %v1418_v8 = vsub.f32 %v3155_v56, %v1417_v30 }
 0x2c5   : > { %v1327_v45 = vand.u32 4294901760, %v1271_v41  ;;  %v1276_v10 = vsel %vm409_vm7, %v1273_v34, %v1275_v40  ;;  %v1280_v9 = vsel %vm409_vm7, %v1275_v40, %v1273_v34  ;;  %v3219_v36 = vpack.c.bf16 %v1323_v53, %v1319_v21 }
 0x2c6   : > { %v3221_v18 = vsub.f32 %v1270_v3, %v1329_v39  ;;  %2213 = vmatprep.subr.bf16.mxu0 %v3210_v61  ;;  %v2224_v35 = vpack.c.bf16 %v1413_v50, %v1401_v57  ;;  %v1281_v42 = vmul.f32 %v1276_v10, %v2842_v51  ;;  %v1282_v58 = vmul.f32 %v1280_v9, %v2851_v60 }
 0x2c7   : > { %v3226_v7 = vsub.f32 %v1271_v41, %v1327_v45  ;;  %2215 = vmatpush1.bf16.msra.mxu0 %v3194_v47  ;;  %v1419_v54 = vand.u32 4294901760, %v1418_v8  ;;  %v1423_v20 = vand.u32 4294901760, %v3184_v37  ;;  %v1435_v26 = vand.u32 4294901760, %v3196_v48 }
 0x2c8   : > { %2225 = vmatprep.subr.bf16.mxu1 %v2224_v35  ;;  %v1331_v21 = vand.u32 4294901760, %v1282_v58  ;;  %v1333_v53 = vand.u32 4294901760, %v1281_v42  ;;  %2217 = vmatprep.subr.bf16.mxu0 %v3219_v36  ;;  %v1284_v12 = vpop.permute.xlu0 %1283  ;;  %v1286_v57 = vpop.permute.xlu1 %1285  ;;  %v1429_v51 = vand.u32 4294901760, %v3177_v44  ;;  %v1441_v60 = vand.u32 4294901760, %v3198_v62 }
 0x2c9   : > { %v2226_v1 = vpack.c.bf16 %v1419_v54, %v1407_v24  ;;  %v1287_v52 = vsel %vm434_vm9, %v1284_v12, %v1286_v57  ;;  %v1291_v3 = vsel %vm434_vm9, %v1286_v57, %v1284_v12  ;;  %v1424_v41 = vsub.f32 %v3184_v37, %v1423_v20 }
 0x2ca   : > { %v3239_v34 = vpack.c.bf16 %v1333_v53, %v1329_v39  ;;  %v3241_v50 = vsub.f32 %v1282_v58, %v1331_v21  ;;  %v3243_v40 = vsub.f32 %v1281_v42, %v1333_v53  ;;  %v1292_v8 = vmul.f32 %v1287_v52, %v2903_v63 }
 0x2cb   : > { %2227 = vmatpush1.bf16.msra.mxu1 %v2226_v1  ;;  %v1293_v10 = vmul.f32 %v1291_v3, %v2906_v5  ;;  %2219 = vmatpush1.bf16.msra.mxu0 %v3203_v11  ;;  %v3248_v24 = vpack.c.bf16 %v1331_v21, %v1327_v45  ;;  %v1425_v9 = vand.u32 4294901760, %v1424_v41  ;;  %v1436_v35 = vsub.f32 %v3196_v48, %v1435_v26 }
 0x2cc   : > { %v3253_v39 = vand.u32 4294901760, %v1292_v8  ;;  %v1430_v42 = vsub.f32 %v3177_v44, %v1429_v51  ;;  %v1442_v63 = vsub.f32 %v3198_v62, %v1441_v60  ;;  %v3464_v5 = vand.u32 4294901760, %v3205_v25 }
 0x2cd   : > { %v3262_v58 = vand.u32 4294901760, %v1293_v10  ;;  %2221 = vmatprep.subr.bf16.mxu0 %v3248_v24  ;;  %v1437_v45 = vand.u32 4294901760, %v1436_v35  ;;  %v3460_v54 = vand.u32 4294901760, %v3207_v6  ;;  %v3461_v21 = vand.u32 4294901760, %v3226_v7 }
 0x2ce   : > { %v3268_v53 = vsub.f32 %v1292_v8, %v3253_v39  ;;  %v1431_v12 = vand.u32 4294901760, %v1430_v42  ;;  %v1443_v57 = vand.u32 4294901760, %v1442_v63  ;;  %v1460_v1 = vsub.f32 %v3205_v25, %v3464_v5 }
 0x2cf   : > { %v3274_v52 = vsub.f32 %v1293_v10, %v3262_v58  ;;  %v2228_v3 = vpack.c.bf16 %v1437_v45, %v1425_v9  ;;  %2223 = vmatpush1.bf16.msra.mxu0 %v3239_v34  ;;  %v1466_v41 = vsub.f32 %v3207_v6, %v3460_v54  ;;  %v1472_v8 = vsub.f32 %v3226_v7, %v3461_v21 }
 0x2d0   : > { %v2230_v35 = vpack.c.bf16 %v1443_v57, %v1431_v12  ;;  %1336 = vmatprep.subr.mxu0 %v3262_v58  ;;  %v1461_v42 = vand.u32 4294901760, %v1460_v1  ;;  %v3463_v63 = vand.u32 4294901760, %v3241_v50  ;;  %v3462_v10 = vand.u32 4294901760, %v3221_v18 }
 0x2d1   : > { %2229 = vmatprep.subr.bf16.mxu1 %v2228_v3  ;;  %v1467_v9 = vand.u32 4294901760, %v1466_v41  ;;  %v1489_v45 = vand.u32 4294901760, %v3243_v40  ;;  %v3465_v31 = vand.u32 4294901760, %v3274_v52  ;;  %v1455_v21 = vand.u32 4294901760, %v3149_v16 }
 0x2d2   : > { %2231 = vmatpush1.bf16.msra.mxu1 %v2230_v35  ;;  %v2232_v54 = vpack.c.bf16 %v1461_v42, %v1449_v15  ;;  %v1484_v12 = vsub.f32 %v3241_v50, %v3463_v63  ;;  %v1478_v57 = vsub.f32 %v3221_v18, %v3462_v10  ;;  %v1473_v16 = vand.u32 4294901760, %v1472_v8 }
 0x2d3   : > { %1338 = vmatpush1.msra.mxu0 %v3253_v39  ;;  %v1490_v1 = vsub.f32 %v3243_v40, %v1489_v45  ;;  %v1496_v19 = vsub.f32 %v3274_v52, %v3465_v31  ;;  %v2234_v15 = vpack.c.bf16 %v1467_v9, %v1455_v21  ;;  %v1501_v41 = vand.u32 4294901760, %v3268_v53 }
 0x2d4   : > { %2233 = vmatprep.subr.bf16.mxu1 %v2232_v54  ;;  %v1485_v3 = vand.u32 4294901760, %v1484_v12  ;;  %1391 = vmatmul.mubr.f32.vlgmr.msra.gmra.mrb[4].mxu0 %v1390_v23  ;;  %v1479_v35 = vand.u32 4294901760, %v1478_v57  ;;  %v2272_v31 = vpack.c.bf16 %v1411_v43, %v1399_v55  ;;  %v2240_v23 = vpack.c.bf16 %v3153_v14, %v3130_v29 }
 0x2d5   : > { %v1491_v42 = vand.u32 4294901760, %v1490_v1  ;;  %v1497_v5 = vand.u32 4294901760, %v1496_v19  ;;  %v1502_v54 = vsub.f32 %v3268_v53, %v1501_v41  ;;  %v2242_v21 = vpack.c.bf16 %v3155_v56, %v3132_v33 }
 0x2d6   : > { %2235 = vmatpush1.bf16.msra.mxu1 %v2234_v15  ;;  %v2236_v10 = vpack.c.bf16 %v1485_v3, %v1473_v16  ;;  %v2244_v55 = vpack.c.bf16 %v3196_v48, %v3184_v37  ;;  %v2246_v43 = vpack.c.bf16 %v3198_v62, %v3177_v44  ;;  %v2248_v29 = vpack.c.bf16 %v3205_v25, %v3103_v17 }
 0x2d7   : > { %v2238_v63 = vpack.c.bf16 %v1491_v42, %v1479_v35  ;;  %v1503_v46 = vand.u32 4294901760, %v1502_v54  ;;  %v2250_v14 = vpack.c.bf16 %v3207_v6, %v3109_v38  ;;  %v2254_v8 = vpack.c.bf16 %v3243_v40, %v3221_v18 }
 0x2d8   : > { %2237 = vmatprep.subr.bf16.mxu1 %v2236_v10  ;;  %v2276_v10 = vpack.c.bf16 %v1435_v26, %v1423_v20  ;;  %v2278_v33 = vpack.c.bf16 %v1441_v60, %v1429_v51  ;;  %v3486_v37 = vand.u32 4294901760, %v3241_v50  ;;  %v3487_v48 = vand.u32 4294901760, %v3221_v18 }
 0x2da   : > { %2239 = vmatpush1.bf16.msra.mxu1 %v2238_v63  ;;  %v2274_v63 = vpack.c.bf16 %v1417_v30, %v1405_v0  ;;  %v3484_v0 = vand.u32 4294901760, %v3207_v6  ;;  %v3485_v30 = vand.u32 4294901760, %v3226_v7  ;;  %v2286_v17 = vpack.c.bf16 %v1489_v45, %v3487_v48 }
 0x2db   : > { %1498 = vmatprep.subr.mxu1 %v1497_v5  ;;  %v2252_v5 = vpack.c.bf16 %v3241_v50, %v3226_v7 }
 0x2dc   : > { %v2284_v44 = vpack.c.bf16 %v3486_v37, %v3485_v30 }
 0x2de   : > { %1504 = vmatpush1.msra.mxu1 %v1503_v46 }
 0x2df   : > { %2241 = vmatprep.subr.bf16.mxu1 %v2240_v23  ;;  %1553 = vmatmul.mubr.f32.vlgmr.msra.gmra.mrb[0].mxu1 %v3114_v49 }
 0x2e0   : > { %2243 = vmatpush1.bf16.msra.mxu1 %v2242_v21  ;;  %1659 = vmatprep.mubr.f32.mxu1 %v2582_v2 }
 0x2e1   : > { %2245 = vmatprep.subr.bf16.mxu1 %v2244_v55 }
 0x2e4   : > { %2247 = vmatpush1.bf16.msra.mxu1 %v2246_v43 }
 0x2e5   : > { %2249 = vmatprep.subr.bf16.mxu1 %v2248_v29 }
 0x2e8   : > { %2251 = vmatpush1.bf16.msra.mxu1 %v2250_v14 }
 0x2e9   : > { %2253 = vmatprep.subr.bf16.mxu1 %v2252_v5 }
 0x2ec   : > { %2255 = vmatpush1.bf16.msra.mxu1 %v2254_v8 }
 0x2ed   : > { %1609 = vmatprep.subr.mxu1 %v3274_v52 }
 0x2f0   : > { %1612 = vmatpush1.msra.mxu1 %v3268_v53 }
 0x2f1   : > { %2257 = vmatprep.subr.bf16.mxu1 %v3159_v22  ;;  %1662 = vmatmul.mubr.f32.vlgmr.msra.gmra.mrb[0].mxu1 %v3119_v27 }
 0x2f2   : > { %2259 = vmatpush1.bf16.msra.mxu1 %v3151_v32  ;;  %1750 = vmatprep.mubr.f32.mxu1 %v2582_v2 }
 0x2f3   : > { %2261 = vmatprep.subr.bf16.mxu1 %v3210_v61 }
 0x2f6   : > { %2263 = vmatpush1.bf16.msra.mxu1 %v3194_v47 }
 0x2f7   : > { %2265 = vmatprep.subr.bf16.mxu1 %v3219_v36 }
 0x2fa   : > { %2267 = vmatpush1.bf16.msra.mxu1 %v3203_v11 }
 0x2fb   : > { %2269 = vmatprep.subr.bf16.mxu1 %v3248_v24 }
 0x2fe   : > { %2271 = vmatpush1.bf16.msra.mxu1 %v3239_v34 }
 0x2ff   : > { %1701 = vmatprep.subr.mxu1 %v3262_v58 }
 0x302   : > { %1703 = vmatpush1.msra.mxu1 %v3253_v39 }
 0x303   : > { %2273 = vmatprep.subr.bf16.mxu1 %v2272_v31  ;;  %1754 = vmatmul.mubr.f32.vlgmr.msra.gmra.mrb[0].mxu1 %v1388_v28  ;;  %v3482_v31 = vand.u32 4294901760, %v3205_v25  ;;  %v3483_v28 = vand.u32 4294901760, %v3109_v38 }
 0x304   : > { %2275 = vmatpush1.bf16.msra.mxu1 %v2274_v63  ;;  %1878 = vmatprep.mubr.f32.mxu1 %v2582_v2 }
 0x305   : > { %2277 = vmatprep.subr.bf16.mxu1 %v2276_v10  ;;  %v2280_v27 = vpack.c.bf16 %v3482_v31, %v1447_v4  ;;  %v2282_v56 = vpack.c.bf16 %v3484_v0, %v3483_v28  ;;  %v3488_v4 = vand.u32 4294901760, %v3274_v52  ;;  %v2030_v28 = vpop.permute.xlu1 %2029 }
 0x308   : > { %2279 = vmatpush1.bf16.msra.mxu1 %v2278_v33 }
 0x309   : > { %2281 = vmatprep.subr.bf16.mxu1 %v2280_v27  ;;  %v501_v37 = vpop.permute.xlu1 %500 }
 0x30c   : > { %2283 = vmatpush1.bf16.msra.mxu1 %v2282_v56 }
 0x30d   : > { %2285 = vmatprep.subr.bf16.mxu1 %v2284_v44 }
 0x310   : > { %2287 = vmatpush1.bf16.msra.mxu1 %v2286_v17 }
 0x311   : > { %1827 = vmatprep.subr.mxu1 %v3488_v4 }
 0x314   : > { %1831 = vmatpush1.msra.mxu1 %v1501_v41 }
 0x315   : > { %2289 = vmatprep.subr.bf16.mxu1 %v3159_v22  ;;  %1880 = vmatmul.mubr.f32.vlgmr.msra.gmra.mrb[0].mxu1 %v3114_v49 }
 0x316   : > { %2291 = vmatpush1.bf16.msra.mxu1 %v3151_v32  ;;  %1968 = vmatprep.mubr.f32.mxu1 %v2582_v2  ;;  %v1297_v32 = vpop.permute.xlu0 %1296 }
 0x317   : > { %2293 = vmatprep.subr.bf16.mxu1 %v3210_v61 }
 0x31a   : > { %2295 = vmatpush1.bf16.msra.mxu1 %v3194_v47  ;;  %v2036_v44 = vpop.permute.xlu0 %2035 }
 0x31b   : > { %2297 = vmatprep.subr.bf16.mxu1 %v3219_v36 }
 0x31e   : > { %2299 = vmatpush1.bf16.msra.mxu1 %v3203_v11 }
 0x31f   : > { %2301 = vmatprep.subr.bf16.mxu1 %v3248_v24 }
 0x322   : > { %2303 = vmatpush1.bf16.msra.mxu1 %v3239_v34 }
 0x323   : > { %1919 = vmatprep.subr.mxu1 %v3262_v58 }
 0x326   : > { %1921 = vmatpush1.msra.mxu1 %v3253_v39 }
 0x327   : > { %1970 = vmatmul.mubr.f32.vlgmr.msra.gmra.mrb[0].mxu1 %v3114_v49 }
 0x3a7   : > { %v1392_v38 = vpop.f32.mrb[4].mxu0 }
 0x3a8   : > { %v1394_v2 = vpop.f32.mrb[5].mxu0  ;;  %v1393_v22 = vadd.f32 %v1392_v38, %v1297_v32  ;;  %v2306_v38 = vadd.f32 %v3048_v59, %v501_v37 }
 0x3a9   : > { %v1395_v62 = vadd.f32 %v1394_v2, %v1297_v32  ;;  %v2307_v32 = vadd.f32 %v3050_v13, %v501_v37 }
 0x3fa   : > { %v1971_v47 = vpop.f32.mrb[0].mxu1 }
 0x3fb   : > { %v2309_v25 = vadd.f32 %v1971_v47, %v1393_v22  ;;  %v1973_v6 = vpop.f32.mrb[1].mxu1 }
 0x3fc   : > { %v2311_v61 = vadd.f32 %v1973_v6, %v1395_v62 }
 0x3fd   : > { %v1976_v11 = vrot.slane %v2309_v25, 4 }
 0x3fe   : > { %v1982_v36 = vrot.slane %v2311_v61, 4 }
 0x3ff   : > { %v1977_v18 = vadd.f32 %v2309_v25, %v1976_v11 }
 0x400   : > { %v1983_v7 = vadd.f32 %v2311_v61, %v1982_v36 }
 0x401   : > { %v1978_v20 = vrot.slane %v1977_v18, 2 }
 0x402   : > { %v1984_v26 = vrot.slane %v1983_v7, 2 }
 0x403   : > { %v1979_v51 = vadd.f32 %v1978_v20, %v1977_v18 }
 0x404   : > { %v1985_v60 = vadd.f32 %v1984_v26, %v1983_v7 }
 0x405   : > { %v1980_v34 = vrot.slane %v1979_v51, 1 }
 0x406   : > { %v1986_v50 = vrot.slane %v1985_v60, 1 }
 0x407   : > { %v1981_v49 = vadd.f32 %v1980_v34, %v1979_v51 }
 0x408   : > { %v1987_v40 = vadd.f32 %v1986_v50, %v1985_v60 }
 0x409   : > { %v1988_v24 = vmul.f32 0.125, %v1981_v49 }
 0x40a   : > { %v1989_v39 = vmul.f32 0.125, %v1987_v40 }
 0x40b   : > { %v1990_v58 = vsub.f32 %v2309_v25, %v1988_v24 }
 0x40c   : > { %v1991_v53 = vsub.f32 %v2311_v61, %v1989_v39 }
 0x40d   : > { %v1992_v52 = vmul.f32 %v1990_v58, %v1990_v58 }
 0x40e   : > { %v1993_v9 = vmul.f32 %v1991_v53, %v1991_v53 }
 0x40f   : > { %v1994_v45 = vrot.slane %v1992_v52, 4 }
 0x410   : > { %v2000_v12 = vrot.slane %v1993_v9, 4 }
 0x411   : > { %v1995_v57 = vadd.f32 %v1994_v45, %v1992_v52 }
 0x412   : > { %v2001_v1 = vadd.f32 %v2000_v12, %v1993_v9 }
 0x413   : > { %v1996_v19 = vrot.slane %v1995_v57, 2 }
 0x414   : > { %v2002_v15 = vrot.slane %v2001_v1, 2 }
 0x415   : > { %v1997_v16 = vadd.f32 %v1996_v19, %v1995_v57 }
 0x416   : > { %v2003_v3 = vadd.f32 %v2002_v15, %v2001_v1 }
 0x417   : > { %v1998_v41 = vrot.slane %v1997_v16, 1 }
 0x418   : > { %v2004_v35 = vrot.slane %v2003_v3, 1 }
 0x419   : > { %v1999_v42 = vadd.f32 %v1998_v41, %v1997_v16 }
 0x41a   : > { %v2005_v54 = vadd.f32 %v2004_v35, %v2003_v3 }
 0x41b   : > { %v2006_v46 = vmul.f32 0.14285715, %v1999_v42 }
 0x41c   : > { %v2007_v23 = vmul.f32 0.14285715, %v2005_v54 }
 0x41d   : > { %2433 = vrsqrt.f32 %v2006_v46  ;;  %vm2010_vm15 = vcmp.eq.f32.partialorder %v2006_v46, inf  ;;  %v2013_v29 = vand.u32 2147483648, %v2006_v46  ;;  %vm2012_vm0 = vcmp.eq.f32.partialorder %v2006_v46, 0.0 }
 0x41e   : > { %2435 = vrsqrt.f32 %v2007_v23  ;;  %vm2017_vm1 = vcmp.eq.f32.partialorder %v2007_v23, inf  ;;  %v2020_v8 = vand.u32 2147483648, %v2007_v23  ;;  %vm2019_vm2 = vcmp.eq.f32.partialorder %v2007_v23, 0.0 }
 0x427   : > { %v2434_v21 = vpop.eup %2433 }
 0x428   : > { %v2436_v55 = vpop.eup %2435  ;;  %v2009_v43 = vmul.f32 %v2434_v21, %v2006_v46 }
 0x429   : > { %v2016_v14 = vmul.f32 %v2436_v55, %v2007_v23 }
 0x42a   : > { %v2011_v5 = vsel %vm2010_vm15, %v2006_v46, %v2009_v43 }
 0x42b   : > { %v2014_v63 = vsel %vm2012_vm0, %v2013_v29, %v2011_v5  ;;  %v2018_v10 = vsel %vm2017_vm1, %v2007_v23, %v2016_v14 }
 0x42c   : > { %v2021_v33 = vsel %vm2019_vm2, %v2020_v8, %v2018_v10  ;;  %v2022_v31 = vadd.f32 0.001, %v2014_v63 }
 0x42d   : > { %v2023_v27 = vadd.f32 0.001, %v2021_v33 }
 0x42e   : > { %2437 = vrcp.f32 %v2022_v31 }
 0x42f   : > { %2439 = vrcp.f32 %v2023_v27 }
 0x438   : > { %v2438_v0 = vpop.eup %2437 }
 0x439   : > { %v2440_v56 = vpop.eup %2439  ;;  %v2025_v30 = vmul.f32 %v2438_v0, %v1990_v58 }
 0x43a   : > { %v2027_v48 = vmul.f32 %v2440_v56, %v1991_v53 }
 0x43b   : > { %v2032_v17 = vmul.f32 %v2030_v28, %v2025_v30 }
 0x43c   : > { %v2033_v4 = vmul.f32 %v2030_v28, %v2027_v48 }
 0x43d   : > { %v2038_v2 = vadd.f32 %v2036_v44, %v2032_v17 }
 0x43e   : > { %v2039_v22 = vadd.f32 %v2036_v44, %v2033_v4 }
 0x43f   : > { %v2040_v62 = vadd.f32 %v2306_v38, %v2038_v2 }
 0x440   : > { %v2041_v47 = vadd.f32 %v2307_v32, %v2039_v22 }
 0x441   : > { %v2042_v25 = vmax.f32 %v2040_v62, 0.0 }
 0x442   : > { %v2043_v6 = vmax.f32 %v2041_v47, 0.0 }
 0x443   : > { %2044 = vst [vmem:[%s247_s13] sm:$0xff] %v2042_v25 }
 0x444   : > { %2045 = vst [vmem:[%s247_s13 + $0x8] sm:$0xff] %v2043_v6 }
 0x445   : > { %2510 = shalt.err (!%p2507_p11)
}
 0x446   : > { %s2511_s6 = scalar_lea.hbm %s3401_s17, 256  ;;  %s2515_s9 = scalar_lea.hbm %s3448_s5, 512 }
 0x447   : > { %p2512_p13 = scmp.ne.s32.totalorder %s3401_s17, %s2511_s6  ;;  %p2516_p6 = scmp.lt.u32.totalorder %s3401_s17, %s3448_s5 }
 0x448   : > { %p2517_p9 = scmp.lt.u32.totalorder %s2515_s9, %s2511_s6  ;;  %p2519_p12 = scmp.lt.u32.totalorder %s2511_s6, %s3401_s17 }
 0x449   : > { %p2513_p0 = pnand %p2512_p13, %p3489_p1 }
 0x44a   : > { %p2518_p10 = por %p2517_p9, %p2516_p6 }
 0x44b   : > { %p2514_p5 = pneg %p2513_p0 }
 0x44c   : > { %p2520_p2 = por %p2519_p12, %p2518_p10 }
 0x44e   : > { %p2521_p3 = pnand %p2520_p2, %p2514_p5 }
 0x450   : > { %2524 = shalt.err (!%p2521_p3)
}
 0x451   : > { %2348 = dma.vmem_to_hbm [thread:$0]  (%p3489_p1), %s3403_s14, 256, %s3401_s17, %s2047_s7  }
 0x452 PF: > { %p2365_p4 = scmp.ge.s32.totalorder %s2567_s21, 2  ;;  %s2073_s12 = sand.u32 1, %s2555_s18  }
 0x453   : > { %p3490_p7 = scmp.ne.s32.totalorder %s3467_s29, 0  ;;  %s2074_s13 = scalar_lea.sflag [#allocation4], %s2073_s12 }
 0x455   : > { %p2358_p8 = pnand %p2365_p4, %p3490_p7 }
 0x457   : > { %2550 = dma.done.wait (!%p2358_p8), %s2074_s13, 256  }
 0x458   : > { %2552 = vsyncadd (!%p2358_p8), %s2074_s13, 4294967040  ;;  %p17_p11 = scmp.ge.s32.totalorder %s2644_s24, 4   ;;  %s3491_s18 = smov %s2559_s19 }
 0x459   : > { %s3492_s19 = smov %s2563_s20  ;;  %s3493_s20 = smov %s2655_s27 }
 0x45a   : > { %s3494_s21 = smov %s2644_s24  ;;  %19 = sbr.rel (!%p17_p11) target bundleno = 5 (0x5), region = 91 }
 0x461   :  { %2079 = vsyncpa [#allocation3], 1 }
 0x462   :  { %2081 = vsyncpa [#allocation3 + $0x1], 1 }
 0x463   :  { %2082 = vsyncpa [#allocation6], 1 }
 0x464   :  { %2083 = vsyncpa [#allocation4], 1 }
 0x465   :  { %2085 = vsyncpa [#allocation4 + $0x1], 1 }

</bundles_post_ra>
